<compile_context>
chip_gen: v6e
topology: v6e:2x2x1
jax: 0.10.0
libtpu: 0.0.40
codegen_flags: <defaults>
</compile_context>

<pallas_src>
import jax
import jax.numpy as jnp
from jax.experimental import pallas as pl
from jax.experimental.pallas import tpu as pltpu

IN_FEATURES = 27   # 9 board cells one-hot over 3 states ('x', 'o', blank)
IN_PADDED = 32     # fc1 K dim zero-padded for aligned sublane packing
HIDDEN = 64
OUT_FEATURES = 9
MAX_TILE_B = 2048  # batch tile cap on the lane axis (multiple of 128)
SMALL_BATCH = 512  # below this, plain XLA beats any Pallas launch


def _mlp_kernel(x_ref, w1_ref, b1_ref, w2_ref, b2_ref, w3_ref, b3_ref, o_ref):
    # x_ref: (32, TB) bf16 ; w*: (out, in) bf16 ; b*: (out, 1) f32 ; o_ref: (9, TB) f32
    x = x_ref[...]
    # fc1 + relu: (64, 32) @ (32, TB) -> (64, TB), f32 accumulate on the MXU
    h1 = jnp.dot(w1_ref[...], x, preferred_element_type=jnp.float32)
    h1 = jnp.maximum(h1 + b1_ref[...], 0.0)
    # fc2 + relu: (64, 64) @ (64, TB) -> (64, TB)
    h2 = jnp.dot(w2_ref[...], h1.astype(jnp.bfloat16), preferred_element_type=jnp.float32)
    h2 = jnp.maximum(h2 + b2_ref[...], 0.0)
    # fc3 (logits): (9, 64) @ (64, TB) -> (9, TB)
    out = jnp.dot(w3_ref[...], h2.astype(jnp.bfloat16), preferred_element_type=jnp.float32)
    o_ref[...] = (out + b3_ref[...]).astype(o_ref.dtype)


def _resident(a):
    # Whole-array block, constant block index -> stays in VMEM, not re-DMA'd per grid step.
    return pl.BlockSpec(a.shape, lambda i: (0,) * a.ndim)


def _choose_tile(batch, tile_b=None, max_tile=MAX_TILE_B):
    """Largest tile <= max_tile that still yields >= 2 grid steps (v7x has 2 TensorCores)."""
    if tile_b is not None:
        return tile_b
    half = -(-batch // 2)                 # cdiv(batch, 2)
    half_rounded = -(-half // 128) * 128  # round up to a lane-dense multiple of 128
    return max(128, min(max_tile, half_rounded))


def tictactoe_forward_fm(x_fm, params, tile_b=None):
    """Fast path. x_fm: (27 or 32, B) feature-major (any float dtype). Returns (9, B) f32.

    Feed (32, B) bf16 with B a multiple of the tile to skip all wrapper-side padding work.
    """
    F, B = x_fm.shape
    tile_b = _choose_tile(B, tile_b)
    n_tiles = pl.cdiv(B, tile_b)
    B_pad = n_tiles * tile_b

    x_fm = x_fm.astype(jnp.bfloat16)
    pad_rows = IN_PADDED - F
    pad_cols = B_pad - B
    if pad_rows or pad_cols:
        x_fm = jnp.pad(x_fm, ((0, pad_rows), (0, pad_cols)))

    w1, b1, w2, b2, w3, b3 = (params[k] for k in ("w1", "b1", "w2", "b2", "w3", "b3"))

    flops = 2 * B_pad * (IN_PADDED * HIDDEN + HIDDEN * HIDDEN + HIDDEN * OUT_FEATURES)
    bytes_accessed = (
        IN_PADDED * B_pad * 2                                            # x (bf16)
        + sum(int(params[k].size) * params[k].dtype.itemsize for k in params)  # weights/biases
        + OUT_FEATURES * B_pad * 4                                       # logits (f32)
    )

    out_fm = pl.pallas_call(
        _mlp_kernel,
        out_shape=jax.ShapeDtypeStruct((OUT_FEATURES, B_pad), jnp.float32),
        grid=(n_tiles,),
        in_specs=[
            pl.BlockSpec((IN_PADDED, tile_b), lambda i: (0, i)),  # batch tile of x
            _resident(w1), _resident(b1),
            _resident(w2), _resident(b2),
            _resident(w3), _resident(b3),
        ],
        out_specs=pl.BlockSpec((OUT_FEATURES, tile_b), lambda i: (0, i)),
        compiler_params=pltpu.CompilerParams(dimension_semantics=("parallel",)),
        cost_estimate=pl.CostEstimate(
            flops=flops, transcendentals=0, bytes_accessed=bytes_accessed),
    )(x_fm, w1, b1, w2, b2, w3, b3)

    return out_fm[:, :B] if pad_cols else out_fm


def tictactoe_forward(x, params, tile_b=None):
    """Compatibility path matching nn.Module semantics: (B, 27) float -> (B, 9) f32."""
    B = x.shape[0]
    if B < SMALL_BATCH:
        # Tiny / interactive batches: plain XLA einsum chain is strictly faster than a
        # padded kernel launch plus layout passes.
        return reference_forward(x, params)
    return tictactoe_forward_fm(x.T.astype(jnp.bfloat16), params, tile_b).T


def pack_params(w1, b1, w2, b2, w3, b3):
    """Pack PyTorch-layout arrays (weights (out,in), biases (out,)) into kernel params."""
    w1p = jnp.zeros((HIDDEN, IN_PADDED), jnp.bfloat16).at[:, : w1.shape[1]].set(
        jnp.asarray(w1, jnp.bfloat16))
    return {
        "w1": w1p,
        "b1": jnp.asarray(b1, jnp.float32).reshape(HIDDEN, 1),
        "w2": jnp.asarray(w2, jnp.bfloat16),
        "b2": jnp.asarray(b2, jnp.float32).reshape(HIDDEN, 1),
        "w3": jnp.asarray(w3, jnp.bfloat16),
        "b3": jnp.asarray(b3, jnp.float32).reshape(OUT_FEATURES, 1),
    }


def init_params(key):
    """Deterministic init mirroring nn.Linear fan-in uniform; fc1 weight zero-padded to K=32."""
    k1, k2, k3, k4, k5, k6 = jax.random.split(key, 6)

    def uniform_fan_in(k, shape, fan_in):
        bound = 1.0 / jnp.sqrt(fan_in)
        return jax.random.uniform(k, shape, jnp.float32, -bound, bound)

    return pack_params(
        uniform_fan_in(k1, (HIDDEN, IN_FEATURES), IN_FEATURES),
        uniform_fan_in(k2, (HIDDEN,), IN_FEATURES),
        uniform_fan_in(k3, (HIDDEN, HIDDEN), HIDDEN),
        uniform_fan_in(k4, (HIDDEN,), HIDDEN),
        uniform_fan_in(k5, (OUT_FEATURES, HIDDEN), HIDDEN),
        uniform_fan_in(k6, (OUT_FEATURES,), HIDDEN),
    )


def reference_forward(x, p):
    """Pure-JAX reference with the same bf16-operand / f32-accumulate numerics. x: (B, 27)."""
    xb = x.astype(jnp.bfloat16)
    w1 = p["w1"][:, : x.shape[1]]
    h1 = jnp.maximum(
        jnp.dot(xb, w1.T, preferred_element_type=jnp.float32) + p["b1"].T, 0.0)
    h2 = jnp.maximum(
        jnp.dot(h1.astype(jnp.bfloat16), p["w2"].T, preferred_element_type=jnp.float32)
        + p["b2"].T, 0.0)
    return (jnp.dot(h2.astype(jnp.bfloat16), p["w3"].T, preferred_element_type=jnp.float32)
            + p["b3"].T)


if __name__ == "__main__":
    key = jax.random.PRNGKey(0)
    k_params, k_x = jax.random.split(key)

    params = init_params(k_params)

    # Bulk self-play batch: exercises the kernel with tile_b=2048 -> 2 parallel grid steps.
    B = 4096
    cells = jax.random.randint(k_x, (B, 9), 0, 3)

    # Upstream emits the one-hot already feature-major (27, B) bf16 — no wrapper transpose.
    x_fm = jnp.transpose(jax.nn.one_hot(cells, 3, dtype=jnp.bfloat16), (1, 2, 0)).reshape(
        IN_FEATURES, B)
    # Row-major copy only used by the pure-JAX reference / compatibility tests.
    x_rm = jax.nn.one_hot(cells, 3, dtype=jnp.float32).reshape(B, IN_FEATURES)

    logits_fm = jax.block_until_ready(tictactoe_forward_fm(x_fm, params))
    ref = reference_forward(x_rm, params)
    assert logits_fm.shape == (OUT_FEATURES, B)
    assert jnp.allclose(logits_fm.T, ref, atol=1e-2, rtol=1e-2)

    # Ragged (non-tile-multiple) batch through the compatibility wrapper (kernel path).
    B2 = 2200
    out2 = jax.block_until_ready(tictactoe_forward(x_rm[:B2], params))
    assert out2.shape == (B2, OUT_FEATURES)
    assert jnp.allclose(out2, ref[:B2], atol=1e-2, rtol=1e-2)

    # Tiny batch dispatches to the XLA path (no padded kernel launch).
    out_small = jax.block_until_ready(tictactoe_forward(x_rm[:8], params))
    assert out_small.shape == (8, OUT_FEATURES)
    assert jnp.allclose(out_small, ref[:8], atol=1e-2, rtol=1e-2)

    print("KERNEL_OK")
</pallas_src>

<mosaic_0001>
module attributes {stable_mosaic.version = 11 : i64} {
  func.func @_mlp_kernel(%arg0: i32, %arg1: memref<32x2048xbf16, #tpu.memory_space<vmem>>, %arg2: memref<64x32xbf16, #tpu.memory_space<vmem>>, %arg3: memref<64x1xf32, #tpu.memory_space<vmem>>, %arg4: memref<64x64xbf16, #tpu.memory_space<vmem>>, %arg5: memref<64x1xf32, #tpu.memory_space<vmem>>, %arg6: memref<9x64xbf16, #tpu.memory_space<vmem>>, %arg7: memref<9x1xf32, #tpu.memory_space<vmem>>, %arg8: memref<9x2048xf32, #tpu.memory_space<vmem>>) attributes {dimension_semantics = [#tpu.dimension_semantics<parallel>], iteration_bounds = array<i64: 2>, scalar_prefetch = 0 : i64, scratch_operands = 0 : i64, tpu.core_type = #tpu.core_type<tc>, window_params = [{transform_indices = @transform_0, window_bounds = array<i64: 32, 2048>}, {pipeline_mode = #tpu.pipeline_mode<synchronous>, transform_indices = @transform_1, window_bounds = array<i64: 64, 32>}, {pipeline_mode = #tpu.pipeline_mode<synchronous>, transform_indices = @transform_2, window_bounds = array<i64: 64, 1>}, {pipeline_mode = #tpu.pipeline_mode<synchronous>, transform_indices = @transform_3, window_bounds = array<i64: 64, 64>}, {pipeline_mode = #tpu.pipeline_mode<synchronous>, transform_indices = @transform_4, window_bounds = array<i64: 64, 1>}, {pipeline_mode = #tpu.pipeline_mode<synchronous>, transform_indices = @transform_5, window_bounds = array<i64: 9, 64>}, {pipeline_mode = #tpu.pipeline_mode<synchronous>, transform_indices = @transform_6, window_bounds = array<i64: 9, 1>}, {transform_indices = @transform_7, window_bounds = array<i64: 9, 2048>}]} {
    %c0 = arith.constant 0 : index
    %c0_0 = arith.constant 0 : index
    %0 = vector.load %arg1[%c0, %c0_0] : memref<32x2048xbf16, #tpu.memory_space<vmem>>, vector<32x2048xbf16>
    %c0_1 = arith.constant 0 : index
    %c0_2 = arith.constant 0 : index
    %1 = vector.load %arg2[%c0_1, %c0_2] : memref<64x32xbf16, #tpu.memory_space<vmem>>, vector<64x32xbf16>
    %cst = arith.constant dense<0.000000e+00> : vector<64x2048xf32>
    %2 = tpu.matmul %1, %0, %cst {dimension_numbers = #tpu.dot_dimension_numbers<[1], [0], [0], [1], [0, 0, 1, 1], [], []>} : vector<64x32xbf16>, vector<32x2048xbf16>, vector<64x2048xf32> -> vector<64x2048xf32>
    %c0_3 = arith.constant 0 : index
    %c0_4 = arith.constant 0 : index
    %3 = vector.load %arg3[%c0_3, %c0_4] : memref<64x1xf32, #tpu.memory_space<vmem>>, vector<64x1xf32>
    %4 = vector.broadcast %3 : vector<64x1xf32> to vector<64x2048xf32>
    %5 = arith.addf %2, %4 : vector<64x2048xf32>
    %cst_5 = arith.constant 0.000000e+00 : f32
    %6 = vector.broadcast %cst_5 : f32 to vector<64x2048xf32>
    %7 = arith.maximumf %5, %6 : vector<64x2048xf32>
    %c0_6 = arith.constant 0 : index
    %c0_7 = arith.constant 0 : index
    %8 = vector.load %arg4[%c0_6, %c0_7] : memref<64x64xbf16, #tpu.memory_space<vmem>>, vector<64x64xbf16>
    %9 = arith.truncf %7 : vector<64x2048xf32> to vector<64x2048xbf16>
    %cst_8 = arith.constant dense<0.000000e+00> : vector<64x2048xf32>
    %10 = tpu.matmul %8, %9, %cst_8 {dimension_numbers = #tpu.dot_dimension_numbers<[1], [0], [0], [1], [0, 0, 1, 1], [], []>} : vector<64x64xbf16>, vector<64x2048xbf16>, vector<64x2048xf32> -> vector<64x2048xf32>
    %c0_9 = arith.constant 0 : index
    %c0_10 = arith.constant 0 : index
    %11 = vector.load %arg5[%c0_9, %c0_10] : memref<64x1xf32, #tpu.memory_space<vmem>>, vector<64x1xf32>
    %12 = vector.broadcast %11 : vector<64x1xf32> to vector<64x2048xf32>
    %13 = arith.addf %10, %12 : vector<64x2048xf32>
    %cst_11 = arith.constant 0.000000e+00 : f32
    %14 = vector.broadcast %cst_11 : f32 to vector<64x2048xf32>
    %15 = arith.maximumf %13, %14 : vector<64x2048xf32>
    %c0_12 = arith.constant 0 : index
    %c0_13 = arith.constant 0 : index
    %16 = vector.load %arg6[%c0_12, %c0_13] : memref<9x64xbf16, #tpu.memory_space<vmem>>, vector<9x64xbf16>
    %17 = arith.truncf %15 : vector<64x2048xf32> to vector<64x2048xbf16>
    %cst_14 = arith.constant dense<0.000000e+00> : vector<9x2048xf32>
    %18 = tpu.matmul %16, %17, %cst_14 {dimension_numbers = #tpu.dot_dimension_numbers<[1], [0], [0], [1], [0, 0, 1, 1], [], []>} : vector<9x64xbf16>, vector<64x2048xbf16>, vector<9x2048xf32> -> vector<9x2048xf32>
    %c0_15 = arith.constant 0 : index
    %c0_16 = arith.constant 0 : index
    %19 = vector.load %arg7[%c0_15, %c0_16] : memref<9x1xf32, #tpu.memory_space<vmem>>, vector<9x1xf32>
    %20 = vector.broadcast %19 : vector<9x1xf32> to vector<9x2048xf32>
    %21 = arith.addf %18, %20 : vector<9x2048xf32>
    %c0_17 = arith.constant 0 : index
    %c0_18 = arith.constant 0 : index
    %22 = vector.load %arg8[%c0_17, %c0_18] : memref<9x2048xf32, #tpu.memory_space<vmem>>, vector<9x2048xf32>
    tpu.vector_store %arg8[%c0_17, %c0_18], %21 {strides = array<i32>} : memref<9x2048xf32, #tpu.memory_space<vmem>>, vector<9x2048xf32>,
    return
  }
  func.func @transform_0(%arg0: i32) -> (i32, i32) {
    %c0_i32 = arith.constant 0 : i32
    %c0_i32_0 = arith.constant 0 : i32
    return %c0_i32, %arg0 : i32, i32
  }
  func.func @transform_1(%arg0: i32) -> (i32, i32) {
    %c0_i32 = arith.constant 0 : i32
    %c0_i32_0 = arith.constant 0 : i32
    %c0_i32_1 = arith.constant 0 : i32
    return %c0_i32, %c0_i32_0 : i32, i32
  }
  func.func @transform_2(%arg0: i32) -> (i32, i32) {
    %c0_i32 = arith.constant 0 : i32
    %c0_i32_0 = arith.constant 0 : i32
    %c0_i32_1 = arith.constant 0 : i32
    return %c0_i32, %c0_i32_0 : i32, i32
  }
  func.func @transform_3(%arg0: i32) -> (i32, i32) {
    %c0_i32 = arith.constant 0 : i32
    %c0_i32_0 = arith.constant 0 : i32
    %c0_i32_1 = arith.constant 0 : i32
    return %c0_i32, %c0_i32_0 : i32, i32
  }
  func.func @transform_4(%arg0: i32) -> (i32, i32) {
    %c0_i32 = arith.constant 0 : i32
    %c0_i32_0 = arith.constant 0 : i32
    %c0_i32_1 = arith.constant 0 : i32
    return %c0_i32, %c0_i32_0 : i32, i32
  }
  func.func @transform_5(%arg0: i32) -> (i32, i32) {
    %c0_i32 = arith.constant 0 : i32
    %c0_i32_0 = arith.constant 0 : i32
    %c0_i32_1 = arith.constant 0 : i32
    return %c0_i32, %c0_i32_0 : i32, i32
  }
  func.func @transform_6(%arg0: i32) -> (i32, i32) {
    %c0_i32 = arith.constant 0 : i32
    %c0_i32_0 = arith.constant 0 : i32
    %c0_i32_1 = arith.constant 0 : i32
    return %c0_i32, %c0_i32_0 : i32, i32
  }
  func.func @transform_7(%arg0: i32) -> (i32, i32) {
    %c0_i32 = arith.constant 0 : i32
    %c0_i32_0 = arith.constant 0 : i32
    return %c0_i32, %arg0 : i32, i32
  }
}

</mosaic_0001>

<bundles_post_ra>
// kernel: tpu_custom_call.1
= control target key start
LH: loop header
LB: loop body
LE: loop exit
PB: predicated region body
PF: predicated region fallthrough
CT: control target
= control target key end

     0   :  { %12 = vsyncpa [#allocation3], 0  ;;  %s4403_s0 = inlined_call_operand.hbm [shape: bf16[32,4096], index: 0, kind: input, shape index: {}]   ;;  %s4404_s1 = inlined_call_operand.vmem [shape: bf16[64,32], index: 1, kind: input, shape index: {}]   ;;  %s4405_s2 = inlined_call_operand.vmem [shape: f32[64,1], index: 2, kind: input, shape index: {}]   ;;  %s4406_s3 = inlined_call_operand.vmem [shape: bf16[64,64], index: 3, kind: input, shape index: {}]   ;;  %s4407_s4 = inlined_call_operand.vmem [shape: f32[64,1], index: 4, kind: input, shape index: {}]   ;;  %s4408_s5 = inlined_call_operand.vmem [shape: bf16[9,64], index: 5, kind: input, shape index: {}]   ;;  %s4409_s6 = inlined_call_operand.vmem [shape: f32[9,1], index: 6, kind: input, shape index: {}]   ;;  %s4410_s7 = inlined_call_operand.hbm [shape: f32[9,4096], index: 7, kind: output, shape index: {}]  }
   0x1   :  { %14 = vsyncpa [#allocation3 + $0x1], 0 }
   0x2   :  { %15 = vsyncpa [#allocation4], 0 }
   0x3   :  { %17 = vsyncpa [#allocation4 + $0x1], 0  ;;  %s3043_s24 = smov 0   ;;  %s3045_s25 = smov 0  }
   0x4   :  { %s3047_s26 = smov 0   ;;  %s3049_s27 = smov 0  }
   0x5 LB: > { %s3064_s28 = sadd.s32 4294967295, %s2992_s27   ;;  %s2707_s29 = sadd.s32 4294967294, %s2992_s27   ;;  %s2992_s27 = sphi %s3049_s27, %s4426_s27   ;;  %s2988_s26 = sphi %s3047_s26, %s4425_s26   ;;  %s2984_s25 = sphi %s3045_s25, %s4424_s25   ;;  %s2980_s24 = sphi %s3043_s24, %s4423_s24  }
   0x6   : > { %s3068_s30 = sadd.s32 1, %s2992_s27   ;;  %s30_s8 = sadd.s32 1, %s2988_s26 }
   0x7   : > { %s27_s9 = ssub.s32 %s2992_s27, %s3068_s30  ;;  %p37_p0 = scmp.ne.s32.totalorder %s2988_s26, %s2984_s25 }
   0x8   : > { %p28_p1 = scmp.eq.s32.totalorder %s27_s9, 0  ;;  %p38_p2 = scmp.eq.s32.totalorder %s2992_s27, 0 }
   0x9   : > { %p43_p3 = scmp.ne.s32.totalorder %s2984_s25, %s2980_s24  ;;  %p44_p4 = scmp.eq.s32.totalorder %s3064_s28, 0 }
   0xa   : > { %s3080_s10 = scalar_select %p28_p1, %s2988_s26, %s30_s8  }
   0xb   : > { %p3082_p5 = por %p38_p2, %p37_p0  ;;  %p3086_p6 = por %p44_p4, %p43_p3 }
   0xc   : > { %p193_p7 = scmp.eq.s32.totalorder %s3064_s28, 1  ;;  %p199_p8 = scmp.eq.s32.totalorder %s2707_s29, 1 }
   0xd   : > { %s4414_s12 = scalar_select %p3086_p6, 1, 0 }
   0xe   : > { %p2848_p10 = scmp.lt.s32.totalorder %s2992_s27, 2  ;;  %p3093_p11 = por %p193_p7, %p37_p0 }
   0xf   : > { %p3097_p12 = por %p199_p8, %p43_p3  ;;  %s237_s15 = sand.u32 1, %s2988_s26  }
  0x10   : > { %s4415_s13 = scalar_select %p3093_p11, 1, 0 }
  0x11   : > { %s4416_s14 = scalar_select %p3097_p12, 1, 0 }
  0x12   : > { %s2834_s16 = sshll.u32 %s2992_s27, 10  ;;  %s2710_s17 = sshll.u32 %s237_s15, 8 }
  0x13   : > { %s3106_s20 = scalar_lea.hbm %s4403_s0, %s2834_s16  ;;  %s241_s21 = scalar_lea.vmem [#allocation2], %s2710_s17 }
  0x14   : > { %s248_s22 = sshll.u32 %s241_s21, 4  ;;  %p3110_p13 = pnand %p2848_p10, %p3082_p5  ;;  %s3114_s22 = int_to_ptr.vmem [resolvable:$true] %s248_s22 }
  0x15   : > { %s3117_s29 = scalar_lea.sflag [#allocation3], %s237_s15  ;;  %s2900_s8 = scalar_lea.hbm %s3106_s20, 4096 }
  0x16   : > { %p2901_p1 = scmp.ne.s32.totalorder %s3106_s20, %s2900_s8  ;;  %p2902_p2 = pneg %p3110_p13 }
  0x17   : > { %s2905_s11 = scalar_lea.hbm %s4403_s0, 8192  ;;  %p2906_p5 = scmp.lt.s32.totalorder %s3106_s20, %s4403_s0 }
  0x18   : > { %p2903_p3 = pnand %p2902_p2, %p2901_p1  ;;  %p2907_p7 = scmp.lt.s32.totalorder %s2905_s11, %s2900_s8 }
  0x1a   : > { %p2904_p4 = pneg %p2903_p3  ;;  %p2908_p8 = por %p2907_p7, %p2906_p5 }
  0x1c   : > { %p2909_p10 = pnand %p2908_p8, %p2904_p4 }
  0x1e   : > { %2912 = shalt.err (!%p2909_p10)
}
  0x1f   : > { %s2913_s15 = scalar_lea.vmem %s3114_s22, 4096  ;;  %s2994_s19 = smov [#allocation2]  }
  0x20   : > { %p2914_p9 = scmp.ne.s32.totalorder %s3114_s22, %s2913_s15  ;;  %s2918_s21 = sshll.u32 %s2994_s19, 4  ;;  %s2919_s21 = int_to_ptr.vmem [resolvable:$false] %s2918_s21 }
  0x21   : > { %s2920_s9 = scalar_lea.vmem %s2919_s21, 8192  ;;  %p2921_p3 = scmp.lt.s32.totalorder %s3114_s22, %s2919_s21 }
  0x22   : > { %p2916_p0 = pnand %p2914_p9, %p2902_p2  ;;  %p2922_p12 = scmp.lt.s32.totalorder %s2920_s9, %s2913_s15 }
  0x24   : > { %p2917_p1 = pneg %p2916_p0  ;;  %p2923_p11 = por %p2922_p12, %p2921_p3 }
  0x26   : > { %p2924_p6 = pnand %p2923_p11, %p2917_p1 }
  0x28   : > { %2927 = shalt.err (!%p2924_p6)
}
  0x29   : > { %s2995_s8 = smov 2048   ;;  %s2996_s16 = smov 1024  }
  0x2a   : > { %s2997_s11 = smov 64   ;;  %p256_p9 = scmp.lt.s32.totalorder %s2992_s27, 3 }
  0x2b   : > { %2843 = dma.hbm_to_vmem [thread:$0]  (!%p3110_p13), %s3106_s20, 4096, %s3114_s22, %s3117_s29, %s2995_s8, %s2996_s16, %s2997_s11  }
  0x2c   : > { %p4418_p0 = scmp.ge.s32.totalorder %s2992_s27, 1 }
  0x2e   : > { %p257_p2 = pnand %p4418_p0, %p256_p9 }
  0x2f   : > { %s3142_s17 = sand.u32 (!%p257_p2), 1, %s2984_s25   ;;  %p4419_p6 = scmp.ne.s32.totalorder (!%p257_p2), %s4414_s12, 0 }
  0x30   : > { %260 = sbr.rel (%p257_p2) target bundleno = 870 (0x366), region = 48  ;;  %s2714_s18 = sshll.u32 (!%p257_p2), %s3142_s17, 8 }
  0x31   : > { %s263_s15 = scalar_lea.sflag (!%p257_p2), [#allocation3], %s3142_s17  ;;  %s3148_s19 = scalar_lea.vmem (!%p257_p2), [#allocation2], %s2714_s18 }
  0x35   : > { %2971 = dma.done.wait (%p4419_p6), %s263_s15, 4096  }
  0x36   : > { %2973 = vsyncadd (%p4419_p6), %s263_s15, 4294963200  ;;  %v2998_v0 = vmov 0   ;;  %v316_v1 = vld [vmem:[%s3148_s19 + $0x80] sm:$0xff]  ;;  %v317_v3 = vld [vmem:[%s3148_s19 + $0x88] sm:$0xff]  ;;  %vm568_vm0 = vcmask 261120   ;;  %vm1433_vm1 = vcmask 523264  }
  0x37   : > { %613 = vmatprep.mubr.bf16.mxu0 %v2998_v0  ;;  %686 = vmatprep.mubr.bf16.mxu1 %v2998_v0  ;;  %v324_v2 = vld [vmem:[%s3148_s19 + $0xc0] sm:$0xff]  ;;  %v325_v5 = vld [vmem:[%s3148_s19 + $0xc8] sm:$0xff]  ;;  %v318_v17 = vld [vmem:[%s3148_s19 + $0x90] sm:$0xff]  ;;  %s4287_s11 = scalar_lea.vmem [#allocation5], %s2714_s18  ;;  %s2835_s18 = sshll.u32 %s3064_s28, 11 }
  0x38   : > { %2889 = vset.pattern.permute.xlu0 %v2998_v0  ;;  %2890 = vset.pattern.permute.xlu1 %v2998_v0  ;;  %v2737_v4 = vcombine.high %v316_v1, %v324_v2  ;;  %v2736_v6 = vcombine.low %v316_v1, %v324_v2  ;;  %v300_v7 = vld [vmem:[%s3148_s19] sm:$0xff]  ;;  %v2739_v9 = vcombine.high %v317_v3, %v325_v5  ;;  %v301_v12 = vld [vmem:[%s3148_s19 + $0x8] sm:$0xff]  ;;  %v326_v18 = vld [vmem:[%s3148_s19 + $0xd0] sm:$0xff]  ;;  %s2634_s15 = sshll.u32 %s4287_s11, 4  ;;  %s4352_s12 = scalar_lea.hbm %s4410_s7, %s2835_s18  ;;  %s4356_s15 = int_to_ptr.vmem [resolvable:$true] %s2634_s15 }
  0x39   : > { %v308_v8 = vld [vmem:[%s3148_s19 + $0x40] sm:$0xff]  ;;  %v2738_v10 = vcombine.low %v317_v3, %v325_v5  ;;  %v309_v13 = vld [vmem:[%s3148_s19 + $0x48] sm:$0xff]  ;;  %v319_v19 = vld [vmem:[%s3148_s19 + $0x98] sm:$0xff]  ;;  %v2741_v22 = vcombine.high %v318_v17, %v326_v18  ;;  %v2740_v27 = vcombine.low %v318_v17, %v326_v18  ;;  %s2621_s20 = scalar_lea.sflag [#allocation4], %s3142_s17  ;;  %s2928_s22 = scalar_lea.vmem %s4356_s15, 4096 }
  0x3a   : > { %v2721_v11 = vcombine.high %v300_v7, %v308_v8  ;;  %593 = vmatprep.subr.bf16.mxu0 %v2737_v4  ;;  %v2723_v14 = vcombine.high %v301_v12, %v309_v13  ;;  %666 = vmatprep.subr.bf16.mxu1 %v2739_v9  ;;  %v2720_v15 = vcombine.low %v300_v7, %v308_v8  ;;  %v327_v20 = vld [vmem:[%s3148_s19 + $0xd8] sm:$0xff]  ;;  %v3173_v21 = vld [vmem:[%s4404_s1] sm:$0xff]   ;;  %v302_v24 = vld [vmem:[%s3148_s19 + $0x10] sm:$0xff]  ;;  %p2929_p11 = scmp.ne.s32.totalorder %s4356_s15, %s2928_s22  ;;  %p4420_p12 = scmp.ne.s32.totalorder %s4415_s13, 0 }
  0x3b   : > { %594 = vmatpush1.bf16.msra.mxu0 %v2736_v6  ;;  %667 = vmatpush1.bf16.msra.mxu1 %v2738_v10  ;;  %v2722_v16 = vcombine.low %v301_v12, %v309_v13  ;;  %v2743_v23 = vcombine.high %v319_v19, %v327_v20  ;;  %v310_v25 = vld [vmem:[%s3148_s19 + $0x50] sm:$0xff]  ;;  %v303_v26 = vld [vmem:[%s3148_s19 + $0x18] sm:$0xff]  ;;  %v2742_v29 = vcombine.low %v319_v19, %v327_v20  ;;  %v3185_v33 = vld [vmem:[%s3148_s19 + $0xa0] sm:$0xff]  ;;  %s2999_s23 = smov [#allocation5]  }
  0x3c   : > { %595 = vmatprep.subr.bf16.mxu0 %v2721_v11  ;;  %668 = vmatprep.subr.bf16.mxu1 %v2723_v14  ;;  %v311_v28 = vld [vmem:[%s3148_s19 + $0x58] sm:$0xff]  ;;  %v2725_v30 = vcombine.high %v302_v24, %v310_v25  ;;  %v346_v31 = vld [vmem:[%s4405_s2 + $0x30] sm:$0xff]  ;;  %v3188_v34 = vld [vmem:[%s3148_s19 + $0xe0] sm:$0xff]  ;;  %v2724_v38 = vcombine.low %v302_v24, %v310_v25  ;;  %p2930_p13 = pnand %p2929_p11, %p4420_p12  ;;  %s2932_s29 = sshll.u32 %s2999_s23, 4  ;;  %s2933_s29 = int_to_ptr.vmem [resolvable:$false] %s2932_s29 }
  0x3d   : > { %v2727_v32 = vcombine.high %v303_v26, %v311_v28  ;;  %380 = vperm.xlu0 %2889, %v346_v31   ;;  %v3194_v35 = vld [vmem:[%s3148_s19 + $0xa8] sm:$0xff]  ;;  %v347_v37 = vld [vmem:[%s4405_s2 + $0x38] sm:$0xff]  ;;  %v344_v39 = vld [vmem:[%s4405_s2 + $0x20] sm:$0xff]  ;;  %v2726_v40 = vcombine.low %v303_v26, %v311_v28  ;;  %v2745_v41 = vcombine.high %v3185_v33, %v3188_v34  ;;  %v2744_v62 = vcombine.low %v3185_v33, %v3188_v34  ;;  %s2934_s21 = scalar_lea.vmem %s2933_s29, 8192  ;;  %p2935_p5 = scmp.lt.s32.totalorder %s4356_s15, %s2933_s29 }
  0x3e   : > { %v3197_v36 = vld [vmem:[%s3148_s19 + $0xe8] sm:$0xff]  ;;  %370 = vperm.xlu1 %2890, %v344_v39   ;;  %v342_v45 = vld [vmem:[%s4405_s2 + $0x10] sm:$0xff]  ;;  %v343_v46 = vld [vmem:[%s4405_s2 + $0x18] sm:$0xff]  ;;  %p2931_p4 = pneg %p2930_p13  ;;  %p2936_p7 = scmp.lt.s32.totalorder %s2934_s21, %s2928_s22 }
  0x3f   : > { %596 = vmatpush1.bf16.msra.mxu0 %v2720_v15  ;;  %669 = vmatpush1.bf16.msra.mxu1 %v2722_v16  ;;  %v3211_v42 = vld [vmem:[%s4404_s1 + $0x8] sm:$0xff]   ;;  %v2747_v43 = vcombine.high %v3194_v35, %v3197_v36  ;;  %v3233_v47 = vld [vmem:[%s4404_s1 + $0x10] sm:$0xff]   ;;  %v340_v48 = vld [vmem:[%s4405_s2] sm:$0xff]  ;;  %v2746_v63 = vcombine.low %v3194_v35, %v3197_v36 }
  0x40   : > { %739 = vmatprep.subr.bf16.mxu0 %v2741_v22  ;;  %812 = vmatprep.subr.bf16.mxu1 %v2743_v23  ;;  %v345_v44 = vld [vmem:[%s4405_s2 + $0x28] sm:$0xff]  ;;  %v1371_v50 = vld [vmem:[%s4407_s4 + $0x30] sm:$0xff]  ;;  %v1372_v51 = vld [vmem:[%s4407_s4 + $0x38] sm:$0xff]  ;;  %p2937_p8 = por %p2936_p7, %p2935_p5 }
  0x41   : > { %385 = vperm.xlu0 %2889, %v347_v37   ;;  %v341_v49 = vld [vmem:[%s4405_s2 + $0x8] sm:$0xff]  ;;  %v3256_v52 = vld [vmem:[%s4404_s1 + $0x18] sm:$0xff]   ;;  %v1369_v53 = vld [vmem:[%s4407_s4 + $0x20] sm:$0xff] }
  0x42   : > { %2752 = vmatmul.mubr.msk.bf16.vlgmr.msra.gmra.mxu0 %vm568_vm0, %v3173_v21  ;;  %2756 = vmatmul.mubr.msk.bf16.vlgmr.msra.gmra.mxu1 %vm568_vm0, %v3173_v21  ;;  %v1370_v54 = vld [vmem:[%s4407_s4 + $0x28] sm:$0xff]  ;;  %v1367_v55 = vld [vmem:[%s4407_s4 + $0x10] sm:$0xff]  ;;  %v1368_v56 = vld [vmem:[%s4407_s4 + $0x18] sm:$0xff]  ;;  %p2938_p10 = pnand %p2937_p8, %p2931_p4 }
  0x43   : > { %623 = vmatprep.mubr.bf16.mxu0 %v2998_v0  ;;  %696 = vmatprep.mubr.bf16.mxu1 %v2998_v0  ;;  %v304_v57 = vld [vmem:[%s3148_s19 + $0x20] sm:$0xff]  ;;  %v305_v60 = vld [vmem:[%s3148_s19 + $0x28] sm:$0xff]  ;;  %v322_v3 = vld [vmem:[%s3148_s19 + $0xb0] sm:$0xff] }
  0x44   : > { %740 = vmatpush1.bf16.msra.mxu0 %v2740_v27  ;;  %813 = vmatpush1.bf16.msra.mxu1 %v2742_v29  ;;  %v312_v58 = vld [vmem:[%s3148_s19 + $0x60] sm:$0xff]  ;;  %v313_v61 = vld [vmem:[%s3148_s19 + $0x68] sm:$0xff]  ;;  %v330_v4 = vld [vmem:[%s3148_s19 + $0xf0] sm:$0xff] }
  0x45   : > { %741 = vmatprep.subr.bf16.mxu0 %v2725_v30  ;;  %814 = vmatprep.subr.bf16.mxu1 %v2727_v32  ;;  %v1365_v59 = vld [vmem:[%s4407_s4] sm:$0xff]  ;;  %v2729_v1 = vcombine.high %v304_v57, %v312_v58  ;;  %v2731_v2 = vcombine.high %v305_v60, %v313_v61  ;;  %v323_v5 = vld [vmem:[%s3148_s19 + $0xb8] sm:$0xff]  ;;  %v2728_v8 = vcombine.low %v304_v57, %v312_v58  ;;  %v1366_v9 = vld [vmem:[%s4407_s4 + $0x8] sm:$0xff] }
  0x46   : > { %375 = vperm.xlu1 %2890, %v345_v44   ;;  %360 = vperm.xlu0 %2889, %v342_v45   ;;  %v331_v6 = vld [vmem:[%s3148_s19 + $0xf8] sm:$0xff]  ;;  %v2224_v7 = vld [vmem:[%s4409_s6] sm:$0xff]  ;;  %v2730_v10 = vcombine.low %v305_v60, %v313_v61  ;;  %v2749_v11 = vcombine.high %v322_v3, %v330_v4  ;;  %v2225_v13 = vld [vmem:[%s4409_s6 + $0x8] sm:$0x1]  ;;  %v2748_v18 = vcombine.low %v322_v3, %v330_v4 }
  0x47   : > { %v2751_v12 = vcombine.high %v323_v5, %v331_v6  ;;  %v306_v14 = vld [vmem:[%s3148_s19 + $0x30] sm:$0xff]  ;;  %v307_v16 = vld [vmem:[%s3148_s19 + $0x38] sm:$0xff]  ;;  %v2750_v19 = vcombine.low %v323_v5, %v331_v6 }
  0x48   : > { %742 = vmatpush1.bf16.msra.mxu0 %v2724_v38  ;;  %815 = vmatpush1.bf16.msra.mxu1 %v2726_v40  ;;  %v314_v15 = vld [vmem:[%s3148_s19 + $0x70] sm:$0xff]  ;;  %v315_v17 = vld [vmem:[%s3148_s19 + $0x78] sm:$0xff] }
  0x49   : > { %885 = vmatprep.subr.bf16.mxu0 %v2745_v41  ;;  %958 = vmatprep.subr.bf16.mxu1 %v2747_v43  ;;  %v2733_v20 = vcombine.high %v306_v14, %v314_v15  ;;  %v2735_v22 = vcombine.high %v307_v16, %v315_v17  ;;  %v2732_v23 = vcombine.low %v306_v14, %v314_v15 }
  0x4a   : > { %2753 = vmatmul.mubr.msk.bf16.gmra.mxu0 %vm568_vm0, %v3211_v42  ;;  %2757 = vmatmul.mubr.msk.bf16.gmra.mxu1 %vm568_vm0, %v3211_v42  ;;  %v2734_v24 = vcombine.low %v307_v16, %v315_v17 }
  0x4b   : > { %633 = vmatprep.mubr.bf16.mxu0 %v2998_v0  ;;  %706 = vmatprep.mubr.bf16.mxu1 %v2998_v0 }
  0x4c   : > { %365 = vperm.xlu1 %2890, %v343_v46   ;;  %350 = vperm.xlu0 %2889, %v340_v48  }
  0x50   : > { %355 = vperm.xlu1 %2890, %v341_v49   ;;  %1405 = vperm.xlu0 %2889, %v1371_v50  }
  0x52   : > { %2754 = vmatmul.mubr.msk.bf16.gmra.mxu0 %vm568_vm0, %v3233_v47  ;;  %2758 = vmatmul.mubr.msk.bf16.gmra.mxu1 %vm568_vm0, %v3233_v47 }
  0x53   : > { %643 = vmatprep.mubr.bf16.mxu0 %v2998_v0  ;;  %716 = vmatprep.mubr.bf16.mxu1 %v2998_v0 }
  0x54   : > { %1410 = vperm.xlu1 %2890, %v1372_v51   ;;  %1395 = vperm.xlu0 %2889, %v1369_v53  }
  0x58   : > { %1400 = vperm.xlu1 %2890, %v1370_v54   ;;  %1385 = vperm.xlu0 %2889, %v1367_v55  }
  0x5a   : > { %2755 = vmatmul.mubr.msk.bf16.gmra.mxu0 %vm568_vm0, %v3256_v52  ;;  %2759 = vmatmul.mubr.msk.bf16.gmra.mxu1 %vm568_vm0, %v3256_v52 }
  0x5b   : > { %759 = vmatprep.mubr.bf16.mxu0 %v2998_v0  ;;  %832 = vmatprep.mubr.bf16.mxu1 %v2998_v0 }
  0x5c   : > { %1390 = vperm.xlu1 %2890, %v1368_v56   ;;  %1375 = vperm.xlu0 %2889, %v1365_v59  }
  0x60   : > { %2228 = vperm.xlu0 %2889, %v2224_v7   ;;  %1380 = vperm.xlu1 %2890, %v1366_v9  }
  0x62   : > { %2760 = vmatmul.mubr.msk.bf16.vlgmr.msra.gmra.mxu0 %vm568_vm0, %v3173_v21  ;;  %2764 = vmatmul.mubr.msk.bf16.vlgmr.msra.gmra.mxu1 %vm568_vm0, %v3173_v21 }
  0x63   : > { %769 = vmatprep.mubr.bf16.mxu0 %v2998_v0  ;;  %842 = vmatprep.mubr.bf16.mxu1 %v2998_v0 }
  0x64   : > { %886 = vmatpush1.bf16.msra.mxu0 %v2744_v62  ;;  %959 = vmatpush1.bf16.msra.mxu1 %v2746_v63 }
  0x65   : > { %887 = vmatprep.subr.bf16.mxu0 %v2729_v1  ;;  %960 = vmatprep.subr.bf16.mxu1 %v2731_v2 }
  0x66   : > { %2233 = vperm.xlu1 %2890, %v2225_v13  }
  0x68   : > { %888 = vmatpush1.bf16.msra.mxu0 %v2728_v8  ;;  %961 = vmatpush1.bf16.msra.mxu1 %v2730_v10 }
  0x69   : > { %1031 = vmatprep.subr.bf16.mxu0 %v2749_v11  ;;  %1104 = vmatprep.subr.bf16.mxu1 %v2751_v12 }
  0x6a   : > { %2761 = vmatmul.mubr.msk.bf16.gmra.mxu0 %vm568_vm0, %v3211_v42  ;;  %2765 = vmatmul.mubr.msk.bf16.gmra.mxu1 %vm568_vm0, %v3211_v42 }
  0x6b   : > { %779 = vmatprep.mubr.bf16.mxu0 %v2998_v0  ;;  %852 = vmatprep.mubr.bf16.mxu1 %v2998_v0 }
  0x72   : > { %2762 = vmatmul.mubr.msk.bf16.gmra.mxu0 %vm568_vm0, %v3233_v47  ;;  %2766 = vmatmul.mubr.msk.bf16.gmra.mxu1 %vm568_vm0, %v3233_v47 }
  0x73   : > { %789 = vmatprep.mubr.bf16.mxu0 %v2998_v0  ;;  %862 = vmatprep.mubr.bf16.mxu1 %v2998_v0 }
  0x7a   : > { %2763 = vmatmul.mubr.msk.bf16.gmra.mxu0 %vm568_vm0, %v3256_v52  ;;  %2767 = vmatmul.mubr.msk.bf16.gmra.mxu1 %vm568_vm0, %v3256_v52 }
  0x7b   : > { %905 = vmatprep.mubr.bf16.mxu0 %v2998_v0  ;;  %978 = vmatprep.mubr.bf16.mxu1 %v2998_v0 }
  0x82   : > { %2768 = vmatmul.mubr.msk.bf16.vlgmr.msra.gmra.mxu0 %vm568_vm0, %v3173_v21  ;;  %2772 = vmatmul.mubr.msk.bf16.vlgmr.msra.gmra.mxu1 %vm568_vm0, %v3173_v21 }
  0x83   : > { %915 = vmatprep.mubr.bf16.mxu0 %v2998_v0  ;;  %988 = vmatprep.mubr.bf16.mxu1 %v2998_v0 }
  0x84   : > { %1032 = vmatpush1.bf16.msra.mxu0 %v2748_v18  ;;  %1105 = vmatpush1.bf16.msra.mxu1 %v2750_v19 }
  0x85   : > { %1033 = vmatprep.subr.bf16.mxu0 %v2733_v20  ;;  %1106 = vmatprep.subr.bf16.mxu1 %v2735_v22 }
  0x88   : > { %1034 = vmatpush1.bf16.msra.mxu0 %v2732_v23  ;;  %1107 = vmatpush1.bf16.msra.mxu1 %v2734_v24 }
  0x8a   : > { %2769 = vmatmul.mubr.msk.bf16.gmra.mxu0 %vm568_vm0, %v3211_v42  ;;  %2773 = vmatmul.mubr.msk.bf16.gmra.mxu1 %vm568_vm0, %v3211_v42 }
  0x8b   : > { %925 = vmatprep.mubr.bf16.mxu0 %v2998_v0  ;;  %998 = vmatprep.mubr.bf16.mxu1 %v2998_v0 }
  0x92   : > { %2770 = vmatmul.mubr.msk.bf16.gmra.mxu0 %vm568_vm0, %v3233_v47  ;;  %2774 = vmatmul.mubr.msk.bf16.gmra.mxu1 %vm568_vm0, %v3233_v47 }
  0x93   : > { %935 = vmatprep.mubr.bf16.mxu0 %v2998_v0  ;;  %1008 = vmatprep.mubr.bf16.mxu1 %v2998_v0 }
  0x9a   : > { %2771 = vmatmul.mubr.msk.bf16.gmra.mxu0 %vm568_vm0, %v3256_v52  ;;  %2775 = vmatmul.mubr.msk.bf16.gmra.mxu1 %vm568_vm0, %v3256_v52 }
  0x9b   : > { %1051 = vmatprep.mubr.bf16.mxu0 %v2998_v0  ;;  %1124 = vmatprep.mubr.bf16.mxu1 %v2998_v0 }
  0xa2   : > { %2776 = vmatmul.mubr.msk.bf16.vlgmr.msra.gmra.mxu0 %vm568_vm0, %v3173_v21  ;;  %2780 = vmatmul.mubr.msk.bf16.vlgmr.msra.gmra.mxu1 %vm568_vm0, %v3173_v21 }
  0xa3   : > { %1061 = vmatprep.mubr.bf16.mxu0 %v2998_v0  ;;  %1134 = vmatprep.mubr.bf16.mxu1 %v2998_v0 }
  0xaa   : > { %2777 = vmatmul.mubr.msk.bf16.gmra.mxu0 %vm568_vm0, %v3211_v42  ;;  %2781 = vmatmul.mubr.msk.bf16.gmra.mxu1 %vm568_vm0, %v3211_v42 }
  0xab   : > { %1071 = vmatprep.mubr.bf16.mxu0 %v2998_v0  ;;  %1144 = vmatprep.mubr.bf16.mxu1 %v2998_v0 }
  0xb2   : > { %2778 = vmatmul.mubr.msk.bf16.gmra.mxu0 %vm568_vm0, %v3233_v47  ;;  %2782 = vmatmul.mubr.msk.bf16.gmra.mxu1 %vm568_vm0, %v3233_v47 }
  0xb3   : > { %1081 = vmatprep.mubr.bf16.mxu0 %v2998_v0  ;;  %1154 = vmatprep.mubr.bf16.mxu1 %v2998_v0 }
  0xb8   : > { %v3384_v31 = vpop.permute.xlu0 %380 }
  0xb9   : > { %v3386_v33 = vpop.permute.xlu1 %370 }
  0xba   : > { %2779 = vmatmul.mubr.msk.bf16.gmra.mxu0 %vm568_vm0, %v3256_v52  ;;  %2783 = vmatmul.mubr.msk.bf16.gmra.mxu1 %vm568_vm0, %v3256_v52 }
  0xbb   : > { %1478 = vmatprep.mubr.bf16.mxu0 %v2998_v0  ;;  %1551 = vmatprep.mubr.bf16.mxu1 %v2998_v0 }
  0xbc   : > { %v3392_v39 = vpop.permute.xlu0 %385 }
  0xc1   : > { %v3394_v41 = vpop.permute.xlu1 %375  ;;  %v3396_v47 = vpop.permute.xlu0 %360 }
  0xc7   : > { %v3398_v49 = vpop.permute.xlu1 %365  ;;  %v3400_v55 = vpop.permute.xlu0 %350 }
  0xcb   : > { %v3408_v59 = vpop.permute.xlu1 %355 }
 0x102   : > { %v3376_v21 = vpop.f32.mrf.mxu0  ;;  %v3378_v25 = vpop.f32.mrf.mxu1 }
 0x104   : > { %v617_v26 = vpop.f32.mrf.mxu0  ;;  %v690_v27 = vpop.f32.mrf.mxu1 }
 0x105   : > { %v3403_v57 = vadd.f32 %v617_v26, %v3400_v55  ;;  %v3406_v58 = vadd.f32 %v690_v27, %v3400_v55 }
 0x106   : > { %v3380_v28 = vpop.f32.mrf.mxu0  ;;  %v3382_v29 = vpop.f32.mrf.mxu1 }
 0x108   : > { %v621_v30 = vpop.f32.mrf.mxu0  ;;  %v694_v32 = vpop.f32.mrf.mxu1 }
 0x109   : > { %v3411_v61 = vadd.f32 %v621_v30, %v3408_v59  ;;  %v3414_v62 = vadd.f32 %v694_v32, %v3408_v59 }
 0x10a   : > { %v3388_v34 = vpop.f32.mrf.mxu0  ;;  %v3390_v35 = vpop.f32.mrf.mxu1 }
 0x10c   : > { %v627_v36 = vpop.f32.mrf.mxu0  ;;  %v700_v37 = vpop.f32.mrf.mxu1 }
 0x10d   : > { %v3417_v63 = vadd.f32 %v627_v36, %v3396_v47  ;;  %v3420_v1 = vadd.f32 %v700_v37, %v3396_v47 }
 0x10e   : > { %v629_v38 = vpop.f32.mrf.mxu0  ;;  %v702_v40 = vpop.f32.mrf.mxu1 }
 0x10f   : > { %v3423_v3 = vadd.f32 %v629_v38, %v3398_v49  ;;  %v3426_v4 = vadd.f32 %v702_v40, %v3398_v49 }
 0x110   : > { %v631_v42 = vpop.f32.mrf.mxu0  ;;  %v704_v43 = vpop.f32.mrf.mxu1 }
 0x111   : > { %v3429_v5 = vadd.f32 %v631_v42, %v3398_v49  ;;  %v3432_v6 = vadd.f32 %v704_v43, %v3398_v49 }
 0x112   : > { %v635_v44 = vpop.f32.mrf.mxu0  ;;  %v708_v45 = vpop.f32.mrf.mxu1 }
 0x113   : > { %v3435_v8 = vadd.f32 %v635_v44, %v3386_v33 }
 0x114   : > { %v637_v46 = vpop.f32.mrf.mxu0  ;;  %v710_v48 = vpop.f32.mrf.mxu1 }
 0x115   : > { %v638_v18 = vadd.f32 %v637_v46, %v3386_v33  ;;  %v711_v19 = vadd.f32 %v710_v48, %v3386_v33 }
 0x116   : > { %v639_v50 = vpop.f32.mrf.mxu0  ;;  %v712_v51 = vpop.f32.mrf.mxu1 }
 0x117   : > { %v640_v24 = vadd.f32 %v639_v50, %v3394_v41  ;;  %v713_v26 = vadd.f32 %v712_v51, %v3394_v41  ;;  %v709_v50 = vadd.f32 %v708_v45, %v3386_v33  ;;  %v1230_v51 = vmax.f32 %v638_v18, 0.0 }
 0x118   : > { %v641_v52 = vpop.f32.mrf.mxu0  ;;  %v714_v53 = vpop.f32.mrf.mxu1  ;;  %v626_v45 = vadd.f32 %v3388_v34, %v3396_v47  ;;  %v693_v34 = vadd.f32 %v3382_v29, %v3408_v59  ;;  %v1184_v29 = vmax.f32 %v3414_v62, 0.0 }
 0x119   : > { %v642_v9 = vadd.f32 %v641_v52, %v3394_v41  ;;  %v715_v13 = vadd.f32 %v714_v53, %v3394_v41 }
 0x11a   : > { %v645_v54 = vpop.f32.mrf.mxu0  ;;  %v718_v56 = vpop.f32.mrf.mxu1  ;;  %v1183_v62 = vmax.f32 %v693_v34, 0.0 }
 0x11b   : > { %v646_v14 = vadd.f32 %v645_v54, %v3384_v31  ;;  %v719_v20 = vadd.f32 %v718_v56, %v3384_v31  ;;  %v1246_v36 = vmax.f32 %v642_v9, 0.0  ;;  %v1248_v43 = vmax.f32 %v715_v13, 0.0 }
 0x11c   : > { %v647_v60 = vpop.f32.mrf.mxu0  ;;  %v720_v2 = vpop.f32.mrf.mxu1 }
 0x11d   : > { %v648_v10 = vadd.f32 %v647_v60, %v3384_v31  ;;  %v721_v15 = vadd.f32 %v720_v2, %v3384_v31  ;;  %v1261_v44 = vmax.f32 %v646_v14, 0.0  ;;  %v1263_v53 = vmax.f32 %v719_v20, 0.0 }
 0x11e   : > { %v649_v7 = vpop.f32.mrf.mxu0  ;;  %v722_v12 = vpop.f32.mrf.mxu1  ;;  %v1232_v60 = vmax.f32 %v711_v19, 0.0  ;;  %v1245_v2 = vmax.f32 %v640_v24, 0.0  ;;  %v699_v20 = vadd.f32 %v3390_v35, %v3396_v47  ;;  %v1182_v35 = vmax.f32 %v3411_v61, 0.0 }
 0x11f   : > { %v650_v11 = vadd.f32 %v649_v7, %v3392_v39  ;;  %v723_v16 = vadd.f32 %v722_v12, %v3392_v39  ;;  %v1262_v37 = vmax.f32 %v648_v10, 0.0  ;;  %v1264_v46 = vmax.f32 %v721_v15, 0.0 }
 0x120   : > { %v651_v17 = vpop.f32.mrf.mxu0  ;;  %v724_v23 = vpop.f32.mrf.mxu1  ;;  %v1247_v12 = vmax.f32 %v713_v26, 0.0  ;;  %v1334_v15 = vpack.c.bf16 %v1246_v36, %v1230_v51  ;;  %v1336_v19 = vpack.c.bf16 %v1248_v43, %v1232_v60  ;;  %v1166_v61 = vmax.f32 %v3403_v57, 0.0 }
 0x121   : > { %v652_v22 = vadd.f32 %v651_v17, %v3392_v39  ;;  %v1277_v27 = vmax.f32 %v650_v11, 0.0  ;;  %v725_v30 = vadd.f32 %v724_v23, %v3392_v39  ;;  %v1279_v38 = vmax.f32 %v723_v16, 0.0 }
 0x122   : > { %v3451_v32 = vpop.f32.mrf.mxu0  ;;  %v3453_v42 = vpop.f32.mrf.mxu1  ;;  %v1214_v11 = vmax.f32 %v3429_v5, 0.0  ;;  %v1216_v16 = vmax.f32 %v3432_v6, 0.0  ;;  %v1229_v17 = vmax.f32 %v3435_v8, 0.0  ;;  %v620_v5 = vadd.f32 %v3380_v28, %v3408_v59 }
 0x123   : > { %v1278_v40 = vmax.f32 %v652_v22, 0.0  ;;  %v1280_v48 = vmax.f32 %v725_v30, 0.0  ;;  %v1349_v7 = vpack.c.bf16 %v1277_v27, %v1261_v44  ;;  %v1351_v13 = vpack.c.bf16 %v1279_v38, %v1263_v53 }
 0x124   : > { %v3455_v52 = vpop.f32.mrf.mxu0  ;;  %v3458_v54 = vpop.f32.mrf.mxu1  ;;  %v1198_v22 = vmax.f32 %v3417_v63, 0.0  ;;  %v1231_v23 = vmax.f32 %v709_v50, 0.0  ;;  %v1200_v6 = vmax.f32 %v3420_v1, 0.0  ;;  %v1213_v8 = vmax.f32 %v3423_v3, 0.0 }
 0x125   : > { %v1350_v56 = vpack.c.bf16 %v1278_v40, %v1262_v37  ;;  %v1352_v10 = vpack.c.bf16 %v1280_v48, %v1264_v46  ;;  %v1333_v26 = vpack.c.bf16 %v1245_v2, %v1229_v17  ;;  %v1215_v63 = vmax.f32 %v3426_v4, 0.0 }
 0x126   : > { %v3460_v9 = vpop.f32.mrf.mxu0  ;;  %v3463_v14 = vpop.f32.mrf.mxu1  ;;  %v1335_v27 = vpack.c.bf16 %v1247_v12, %v1231_v23  ;;  %v1318_v36 = vpack.c.bf16 %v1214_v11, %v1198_v22  ;;  %v616_v37 = vadd.f32 %v3376_v21, %v3400_v55  ;;  %v1197_v1 = vmax.f32 %v626_v45, 0.0  ;;  %v3502_v12 = vld [vmem:[%s4406_s3] sm:$0xff]   ;;  %v3513_v22 = vld [vmem:[%s4406_s3 + $0x8] sm:$0xff]  }
 0x127   : > { %1454 = vmatprep.subr.bf16.mxu0 %v1350_v56  ;;  %1527 = vmatprep.subr.bf16.mxu1 %v1352_v10  ;;  %v1320_v3 = vpack.c.bf16 %v1216_v16, %v1200_v6  ;;  %v689_v40 = vadd.f32 %v3378_v25, %v3400_v55  ;;  %v1199_v43 = vmax.f32 %v699_v20, 0.0  ;;  %v1168_v44 = vmax.f32 %v3406_v58, 0.0 }
 0x128   : > { %v3469_v18 = vpop.f32.mrf.mxu0  ;;  %1455 = vmatpush1.bf16.msra.mxu0 %v1349_v7  ;;  %v3476_v24 = vpop.f32.mrf.mxu1  ;;  %1528 = vmatpush1.bf16.msra.mxu1 %v1351_v13  ;;  %v1181_v46 = vmax.f32 %v620_v5, 0.0  ;;  %v1317_v48 = vpack.c.bf16 %v1213_v8, %v1197_v1  ;;  %v1302_v53 = vpack.c.bf16 %v1182_v35, %v1166_v61  ;;  %v1165_v56 = vmax.f32 %v616_v37, 0.0 }
 0x129   : > { %1456 = vmatprep.subr.bf16.mxu0 %v1334_v15  ;;  %1529 = vmatprep.subr.bf16.mxu1 %v1336_v19  ;;  %v1319_v50 = vpack.c.bf16 %v1215_v63, %v1199_v43  ;;  %v1304_v25 = vpack.c.bf16 %v1184_v29, %v1168_v44  ;;  %v1167_v57 = vmax.f32 %v689_v40, 0.0  ;;  %v3517_v23 = vadd.f32 %v3455_v52, %v3400_v55 }
 0x12a   : > { %v3482_v28 = vpop.f32.mrf.mxu0  ;;  %v3486_v30 = vpop.f32.mrf.mxu1  ;;  %v1301_v7 = vpack.c.bf16 %v1181_v46, %v1165_v56  ;;  %v3521_v6 = vadd.f32 %v3458_v54, %v3400_v55  ;;  %v3525_v8 = vadd.f32 %v3469_v18, %v3408_v59 }
 0x12b   : > { %v1303_v10 = vpack.c.bf16 %v1183_v62, %v1167_v57 }
 0x12c   : > { %v773_v38 = vpop.f32.mrf.mxu0  ;;  %1457 = vmatpush1.bf16.msra.mxu0 %v1333_v26  ;;  %v846_v4 = vpop.f32.mrf.mxu1  ;;  %1530 = vmatpush1.bf16.msra.mxu1 %v1335_v27  ;;  %v3529_v26 = vadd.f32 %v3476_v24, %v3408_v59 }
 0x12d   : > { %1458 = vmatprep.subr.bf16.mxu0 %v1318_v36  ;;  %1531 = vmatprep.subr.bf16.mxu1 %v1320_v3  ;;  %v3532_v35 = vadd.f32 %v773_v38, %v3396_v47  ;;  %v3535_v52 = vadd.f32 %v846_v4, %v3396_v47 }
 0x12e   : > { %v775_v21 = vpop.f32.mrf.mxu0  ;;  %v3495_v51 = vpop.f32.mrf.mxu1 }
 0x12f   : > { %v3538_v27 = vadd.f32 %v775_v21, %v3398_v49 }
 0x130   : > { %v777_v60 = vpop.f32.mrf.mxu0  ;;  %1459 = vmatpush1.bf16.msra.mxu0 %v1317_v48  ;;  %v850_v2 = vpop.f32.mrf.mxu1  ;;  %1532 = vmatpush1.bf16.msra.mxu1 %v1319_v50 }
 0x131   : > { %1460 = vmatprep.subr.bf16.mxu0 %v1302_v53  ;;  %1533 = vmatprep.subr.bf16.mxu1 %v1304_v25  ;;  %v3541_v54 = vadd.f32 %v777_v60, %v3398_v49  ;;  %v3544_v18 = vadd.f32 %v850_v2, %v3398_v49 }
 0x132   : > { %v781_v58 = vpop.f32.mrf.mxu0  ;;  %v3497_v11 = vpop.f32.mrf.mxu1 }
 0x133   : > { %v3547_v24 = vadd.f32 %v781_v58, %v3386_v33 }
 0x134   : > { %v783_v13 = vpop.f32.mrf.mxu0  ;;  %1461 = vmatpush1.bf16.msra.mxu0 %v1301_v7  ;;  %v856_v15 = vpop.f32.mrf.mxu1  ;;  %1534 = vmatpush1.bf16.msra.mxu1 %v1303_v10  ;;  %v3576_v10 = vld [vmem:[%s4406_s3 + $0x10] sm:$0xff]  }
 0x135   : > { %v784_v4 = vadd.f32 %v783_v13, %v3386_v33  ;;  %v857_v62 = vadd.f32 %v856_v15, %v3386_v33 }
 0x136   : > { %v785_v45 = vpop.f32.mrf.mxu0  ;;  %v858_v16 = vpop.f32.mrf.mxu1 }
 0x137   : > { %2788 = vmatmul.mubr.msk.bf16.vlgmr.msra.gmra.mxu0 %vm1433_vm1, %v3502_v12  ;;  %2792 = vmatmul.mubr.msk.bf16.vlgmr.msra.gmra.mxu1 %vm1433_vm1, %v3502_v12  ;;  %v786_v50 = vadd.f32 %v785_v45, %v3394_v41  ;;  %v859_v53 = vadd.f32 %v858_v16, %v3394_v41 }
 0x138   : > { %v787_v17 = vpop.f32.mrf.mxu0  ;;  %1488 = vmatprep.mubr.bf16.mxu0 %v2998_v0  ;;  %v860_v19 = vpop.f32.mrf.mxu1  ;;  %1561 = vmatprep.mubr.bf16.mxu1 %v2998_v0 }
 0x139   : > { %v788_v37 = vadd.f32 %v787_v17, %v3394_v41  ;;  %v861_v3 = vadd.f32 %v860_v19, %v3394_v41  ;;  %v855_v19 = vadd.f32 %v3497_v11, %v3386_v33  ;;  %v1218_v11 = vmax.f32 %v3541_v54, 0.0 }
 0x13a   : > { %v791_v5 = vpop.f32.mrf.mxu0  ;;  %v864_v20 = vpop.f32.mrf.mxu1 }
 0x13b   : > { %v792_v44 = vadd.f32 %v791_v5, %v3384_v31  ;;  %v865_v46 = vadd.f32 %v864_v20, %v3384_v31  ;;  %v1250_v13 = vmax.f32 %v788_v37, 0.0  ;;  %v1252_v15 = vmax.f32 %v861_v3, 0.0 }
 0x13c   : > { %v793_v34 = vpop.f32.mrf.mxu0  ;;  %v866_v63 = vpop.f32.mrf.mxu1  ;;  %v1249_v3 = vmax.f32 %v786_v50, 0.0  ;;  %v1233_v50 = vmax.f32 %v3547_v24, 0.0  ;;  %v1217_v24 = vmax.f32 %v3538_v27, 0.0 }
 0x13d   : > { %v794_v29 = vadd.f32 %v793_v34, %v3384_v31  ;;  %v867_v40 = vadd.f32 %v866_v63, %v3384_v31  ;;  %v1265_v5 = vmax.f32 %v792_v44, 0.0  ;;  %v1267_v20 = vmax.f32 %v865_v46, 0.0 }
 0x13e   : > { %v795_v36 = vpop.f32.mrf.mxu0  ;;  %v868_v38 = vpop.f32.mrf.mxu1  ;;  %v1220_v44 = vmax.f32 %v3544_v18, 0.0  ;;  %v766_v18 = vadd.f32 %v3460_v9, %v3408_v59  ;;  %v3621_v9 = vld [vmem:[%s4406_s3 + $0x18] sm:$0xff]  }
 0x13f   : > { %v796_v1 = vadd.f32 %v795_v36, %v3392_v39  ;;  %2789 = vmatmul.mubr.msk.bf16.gmra.mxu0 %vm1433_vm1, %v3513_v22  ;;  %v869_v61 = vadd.f32 %v868_v38, %v3392_v39  ;;  %2793 = vmatmul.mubr.msk.bf16.gmra.mxu1 %vm1433_vm1, %v3513_v22  ;;  %v1266_v25 = vmax.f32 %v794_v29, 0.0  ;;  %v1268_v45 = vmax.f32 %v867_v40, 0.0 }
 0x140   : > { %v797_v43 = vpop.f32.mrf.mxu0  ;;  %1498 = vmatprep.mubr.bf16.mxu0 %v2998_v0  ;;  %v870_v21 = vpop.f32.mrf.mxu1  ;;  %1571 = vmatprep.mubr.bf16.mxu1 %v2998_v0  ;;  %v849_v36 = vadd.f32 %v3495_v51, %v3398_v49  ;;  %v1234_v29 = vmax.f32 %v784_v4, 0.0  ;;  %v1251_v40 = vmax.f32 %v859_v53, 0.0  ;;  %v1235_v53 = vmax.f32 %v855_v19, 0.0 }
 0x141   : > { %v798_v48 = vadd.f32 %v797_v43, %v3392_v39  ;;  %v871_v56 = vadd.f32 %v870_v21, %v3392_v39  ;;  %v1281_v57 = vmax.f32 %v796_v1, 0.0  ;;  %v1283_v2 = vmax.f32 %v869_v61, 0.0 }
 0x142   : > { %v3569_v60 = vpop.f32.mrf.mxu0  ;;  %v3571_v58 = vpop.f32.mrf.mxu1  ;;  %v1236_v1 = vmax.f32 %v857_v62, 0.0  ;;  %v1338_v4 = vpack.c.bf16 %v1250_v13, %v1234_v29  ;;  %v772_v21 = vadd.f32 %v3482_v28, %v3396_v47  ;;  %v845_v62 = vadd.f32 %v3486_v30, %v3396_v47 }
 0x143   : > { %v1282_v7 = vmax.f32 %v798_v48, 0.0  ;;  %v1284_v17 = vmax.f32 %v871_v56, 0.0  ;;  %v1353_v61 = vpack.c.bf16 %v1281_v57, %v1265_v5  ;;  %v1355_v43 = vpack.c.bf16 %v1283_v2, %v1267_v20 }
 0x144   : > { %v3578_v16 = vpop.f32.mrf.mxu0  ;;  %v3582_v34 = vpop.f32.mrf.mxu1  ;;  %v1340_v46 = vpack.c.bf16 %v1252_v15, %v1236_v1  ;;  %v839_v56 = vadd.f32 %v3463_v14, %v3408_v59  ;;  %v1204_v28 = vmax.f32 %v3535_v52, 0.0  ;;  %v1219_v57 = vmax.f32 %v849_v36, 0.0 }
 0x145   : > { %v1354_v63 = vpack.c.bf16 %v1282_v7, %v1266_v25  ;;  %v1356_v37 = vpack.c.bf16 %v1284_v17, %v1268_v45  ;;  %v1202_v25 = vmax.f32 %v3532_v35, 0.0  ;;  %v1337_v2 = vpack.c.bf16 %v1249_v3, %v1233_v50 }
 0x146   : > { %v3586_v38 = vpop.f32.mrf.mxu0  ;;  %v3588_v48 = vpop.f32.mrf.mxu1  ;;  %v1339_v7 = vpack.c.bf16 %v1251_v40, %v1235_v53  ;;  %v1186_v14 = vmax.f32 %v3525_v8, 0.0  ;;  %v1188_v35 = vmax.f32 %v3529_v26, 0.0  ;;  %v1324_v15 = vpack.c.bf16 %v1220_v44, %v1204_v28 }
 0x147   : > { %2790 = vmatmul.mubr.msk.bf16.gmra.mxu0 %vm1433_vm1, %v3576_v10  ;;  %1600 = vmatprep.subr.bf16.mxu0 %v1354_v63  ;;  %v1322_v27 = vpack.c.bf16 %v1218_v11, %v1202_v25  ;;  %v762_v45 = vadd.f32 %v3451_v32, %v3400_v55  ;;  %v835_v17 = vadd.f32 %v3453_v42, %v3400_v55  ;;  %v1201_v19 = vmax.f32 %v772_v21, 0.0 }
 0x148   : > { %2794 = vmatmul.mubr.msk.bf16.gmra.mxu1 %vm1433_vm1, %v3576_v10  ;;  %1673 = vmatprep.subr.bf16.mxu1 %v1356_v37  ;;  %v3596_v51 = vpop.f32.mrf.mxu0  ;;  %v3603_v54 = vpop.f32.mrf.mxu1  ;;  %v1203_v5 = vmax.f32 %v845_v62, 0.0  ;;  %v1170_v63 = vmax.f32 %v3517_v23, 0.0  ;;  %v1172_v8 = vmax.f32 %v3521_v6, 0.0  ;;  %v1185_v36 = vmax.f32 %v766_v18, 0.0 }
 0x149   : > { %1601 = vmatpush1.bf16.msra.mxu0 %v1353_v61  ;;  %1674 = vmatpush1.bf16.msra.mxu1 %v1355_v43  ;;  %v1187_v29 = vmax.f32 %v839_v56, 0.0  ;;  %v1321_v1 = vpack.c.bf16 %v1217_v24, %v1201_v19  ;;  %v1169_v6 = vmax.f32 %v762_v45, 0.0  ;;  %v1171_v40 = vmax.f32 %v835_v17, 0.0 }
 0x14a   : > { %1602 = vmatprep.subr.bf16.mxu0 %v1338_v4  ;;  %1675 = vmatprep.subr.bf16.mxu1 %v1340_v46  ;;  %v3611_v30 = vpop.f32.mrf.mxu0  ;;  %v3614_v13 = vpop.f32.mrf.mxu1  ;;  %v1323_v37 = vpack.c.bf16 %v1219_v57, %v1203_v5  ;;  %v1306_v3 = vpack.c.bf16 %v1186_v14, %v1170_v63  ;;  %v1308_v23 = vpack.c.bf16 %v1188_v35, %v1172_v8 }
 0x14b   : > { %1508 = vmatprep.mubr.bf16.mxu0 %v2998_v0  ;;  %1581 = vmatprep.mubr.bf16.mxu1 %v2998_v0  ;;  %v1305_v11 = vpack.c.bf16 %v1185_v36, %v1169_v6  ;;  %v1307_v44 = vpack.c.bf16 %v1187_v29, %v1171_v40  ;;  %v3649_v24 = vadd.f32 %v3578_v16, %v3400_v55 }
 0x14c   : > { %v919_v52 = vpop.f32.mrf.mxu0  ;;  %v992_v20 = vpop.f32.mrf.mxu1  ;;  %v3653_v57 = vadd.f32 %v3582_v34, %v3400_v55 }
 0x14d   : > { %1603 = vmatpush1.bf16.msra.mxu0 %v1337_v2  ;;  %1676 = vmatpush1.bf16.msra.mxu1 %v1339_v7  ;;  %v3657_v2 = vadd.f32 %v3596_v51, %v3408_v59  ;;  %v3661_v7 = vadd.f32 %v3603_v54, %v3408_v59  ;;  %v3664_v35 = vadd.f32 %v919_v52, %v3396_v47 }
 0x14e   : > { %1604 = vmatprep.subr.bf16.mxu0 %v1322_v27  ;;  %1677 = vmatprep.subr.bf16.mxu1 %v1324_v15  ;;  %v921_v26 = vpop.f32.mrf.mxu0  ;;  %v3631_v32 = vpop.f32.mrf.mxu1  ;;  %v3667_v27 = vadd.f32 %v992_v20, %v3396_v47 }
 0x14f   : > { %2791 = vmatmul.mubr.msk.bf16.gmra.mxu0 %vm1433_vm1, %v3621_v9  ;;  %v3670_v16 = vadd.f32 %v921_v26, %v3398_v49 }
 0x150   : > { %2795 = vmatmul.mubr.msk.bf16.gmra.mxu1 %vm1433_vm1, %v3621_v9  ;;  %v923_v42 = vpop.f32.mrf.mxu0  ;;  %1624 = vmatprep.mubr.bf16.mxu0 %v2998_v0  ;;  %v996_v61 = vpop.f32.mrf.mxu1 }
 0x151   : > { %1605 = vmatpush1.bf16.msra.mxu0 %v1321_v1  ;;  %1678 = vmatpush1.bf16.msra.mxu1 %v1323_v37  ;;  %v3673_v34 = vadd.f32 %v923_v42, %v3398_v49  ;;  %v3676_v51 = vadd.f32 %v996_v61, %v3398_v49 }
 0x152   : > { %1606 = vmatprep.subr.bf16.mxu0 %v1306_v3  ;;  %1679 = vmatprep.subr.bf16.mxu1 %v1308_v23  ;;  %v927_v43 = vpop.f32.mrf.mxu0  ;;  %v3638_v4 = vpop.f32.mrf.mxu1 }
 0x153   : > { %1697 = vmatprep.mubr.bf16.mxu1 %v2998_v0 }
 0x154   : > { %v929_v46 = vpop.f32.mrf.mxu0  ;;  %v1002_v21 = vpop.f32.mrf.mxu1 }
 0x155   : > { %1607 = vmatpush1.bf16.msra.mxu0 %v1305_v11  ;;  %1680 = vmatpush1.bf16.msra.mxu1 %v1307_v44  ;;  %v930_v54 = vadd.f32 %v929_v46, %v3386_v33  ;;  %v1003_v1 = vadd.f32 %v1002_v21, %v3386_v33 }
 0x156   : > { %v931_v62 = vpop.f32.mrf.mxu0  ;;  %v1004_v50 = vpop.f32.mrf.mxu1 }
 0x157   : > { %v932_v37 = vadd.f32 %v931_v62, %v3394_v41  ;;  %v1005_v6 = vadd.f32 %v1004_v50, %v3394_v41  ;;  %v928_v62 = vadd.f32 %v927_v43, %v3386_v33  ;;  %v1001_v50 = vadd.f32 %v3638_v4, %v3386_v33 }
 0x158   : > { %2796 = vmatmul.mubr.msk.bf16.vlgmr.msra.gmra.mxu0 %vm1433_vm1, %v3502_v12  ;;  %2800 = vmatmul.mubr.msk.bf16.vlgmr.msra.gmra.mxu1 %vm1433_vm1, %v3502_v12  ;;  %v933_v53 = vpop.f32.mrf.mxu0  ;;  %v1006_v18 = vpop.f32.mrf.mxu1 }
 0x159   : > { %1634 = vmatprep.mubr.bf16.mxu0 %v2998_v0  ;;  %1707 = vmatprep.mubr.bf16.mxu1 %v2998_v0  ;;  %v934_v19 = vadd.f32 %v933_v53, %v3394_v41  ;;  %v1007_v8 = vadd.f32 %v1006_v18, %v3394_v41 }
 0x15a   : > { %v937_v56 = vpop.f32.mrf.mxu0  ;;  %v1010_v25 = vpop.f32.mrf.mxu1 }
 0x15b   : > { %v938_v26 = vadd.f32 %v937_v56, %v3384_v31  ;;  %v1011_v42 = vadd.f32 %v1010_v25, %v3384_v31  ;;  %v1254_v46 = vmax.f32 %v934_v19, 0.0  ;;  %v1256_v25 = vmax.f32 %v1007_v8, 0.0 }
 0x15c   : > { %v939_v28 = vpop.f32.mrf.mxu0  ;;  %v1012_v14 = vpop.f32.mrf.mxu1  ;;  %v995_v19 = vadd.f32 %v3631_v32, %v3398_v49  ;;  %v1222_v8 = vmax.f32 %v3673_v34, 0.0  ;;  %v918_v32 = vadd.f32 %v3611_v30, %v3396_v47 }
 0x15d   : > { %v940_v45 = vadd.f32 %v939_v28, %v3384_v31  ;;  %v1013_v5 = vadd.f32 %v1012_v14, %v3384_v31  ;;  %v1269_v28 = vmax.f32 %v938_v26, 0.0  ;;  %v1255_v26 = vmax.f32 %v1005_v6, 0.0 }
 0x15e   : > { %v941_v15 = vpop.f32.mrf.mxu0  ;;  %v1014_v17 = vpop.f32.mrf.mxu1  ;;  %v991_v6 = vadd.f32 %v3614_v13, %v3396_v47  ;;  %v1190_v13 = vmax.f32 %v3657_v2, 0.0  ;;  %v1174_v2 = vmax.f32 %v3649_v24, 0.0 }
 0x15f   : > { %v942_v52 = vadd.f32 %v941_v15, %v3392_v39  ;;  %v1015_v20 = vadd.f32 %v1014_v17, %v3392_v39  ;;  %v1270_v40 = vmax.f32 %v940_v45, 0.0  ;;  %v1272_v53 = vmax.f32 %v1013_v5, 0.0 }
 0x160   : > { %2797 = vmatmul.mubr.msk.bf16.gmra.mxu0 %vm1433_vm1, %v3513_v22  ;;  %2801 = vmatmul.mubr.msk.bf16.gmra.mxu1 %vm1433_vm1, %v3513_v22  ;;  %v943_v63 = vpop.f32.mrf.mxu0  ;;  %v1016_v29 = vpop.f32.mrf.mxu1  ;;  %v1238_v45 = vmax.f32 %v930_v54, 0.0  ;;  %v1240_v5 = vmax.f32 %v1003_v1, 0.0  ;;  %v1224_v54 = vmax.f32 %v3676_v51, 0.0  ;;  %v1237_v1 = vmax.f32 %v928_v62, 0.0 }
 0x161   : > { %v944_v36 = vadd.f32 %v943_v63, %v3392_v39  ;;  %1644 = vmatprep.mubr.bf16.mxu0 %v2998_v0  ;;  %1717 = vmatprep.mubr.bf16.mxu1 %v2998_v0  ;;  %v1017_v3 = vadd.f32 %v1016_v29, %v3392_v39  ;;  %v1285_v61 = vmax.f32 %v942_v52, 0.0  ;;  %v1287_v18 = vmax.f32 %v1015_v20, 0.0 }
 0x162   : > { %v3697_v23 = vpop.f32.mrf.mxu0  ;;  %v3700_v44 = vpop.f32.mrf.mxu1  ;;  %v1271_v52 = vmax.f32 %v1011_v42, 0.0  ;;  %v1253_v20 = vmax.f32 %v932_v37, 0.0  ;;  %v1342_v29 = vpack.c.bf16 %v1254_v46, %v1238_v45  ;;  %v1344_v37 = vpack.c.bf16 %v1256_v25, %v1240_v5 }
 0x163   : > { %v1286_v11 = vmax.f32 %v944_v36, 0.0  ;;  %v1288_v56 = vmax.f32 %v1017_v3, 0.0  ;;  %v1357_v36 = vpack.c.bf16 %v1285_v61, %v1269_v28  ;;  %v912_v42 = vadd.f32 %v3586_v38, %v3408_v59 }
 0x164   : > { %v3702_v21 = vpop.f32.mrf.mxu0  ;;  %v3705_v15 = vpop.f32.mrf.mxu1  ;;  %v1359_v3 = vpack.c.bf16 %v1287_v18, %v1271_v52  ;;  %v1239_v61 = vmax.f32 %v1001_v50, 0.0  ;;  %v985_v51 = vadd.f32 %v3588_v48, %v3408_v59  ;;  %v1221_v46 = vmax.f32 %v3670_v16, 0.0 }
 0x165   : > { %v1358_v14 = vpack.c.bf16 %v1286_v11, %v1270_v40  ;;  %v1360_v17 = vpack.c.bf16 %v1288_v56, %v1272_v53  ;;  %v1206_v40 = vmax.f32 %v3664_v35, 0.0  ;;  %v1208_v11 = vmax.f32 %v3667_v27, 0.0 }
 0x166   : > { %v3709_v63 = vpop.f32.mrf.mxu0  ;;  %v3713_v43 = vpop.f32.mrf.mxu1  ;;  %v1341_v53 = vpack.c.bf16 %v1253_v20, %v1237_v1  ;;  %v1223_v35 = vmax.f32 %v995_v19, 0.0  ;;  %v1343_v56 = vpack.c.bf16 %v1255_v26, %v1239_v61  ;;  %v908_v48 = vadd.f32 %v3569_v60, %v3400_v55 }
 0x167   : > { %1746 = vmatprep.subr.bf16.mxu0 %v1358_v14  ;;  %1819 = vmatprep.subr.bf16.mxu1 %v1360_v17  ;;  %v1326_v18 = vpack.c.bf16 %v1222_v8, %v1206_v40  ;;  %v1192_v27 = vmax.f32 %v3661_v7, 0.0  ;;  %v1205_v16 = vmax.f32 %v918_v32, 0.0  ;;  %v1328_v25 = vpack.c.bf16 %v1224_v54, %v1208_v11 }
 0x168   : > { %2798 = vmatmul.mubr.msk.bf16.gmra.mxu0 %vm1433_vm1, %v3576_v10  ;;  %2802 = vmatmul.mubr.msk.bf16.gmra.mxu1 %vm1433_vm1, %v3576_v10  ;;  %v3720_v4 = vpop.f32.mrf.mxu0  ;;  %v3725_v34 = vpop.f32.mrf.mxu1  ;;  %v981_v14 = vadd.f32 %v3571_v58, %v3400_v55  ;;  %v1207_v50 = vmax.f32 %v991_v6, 0.0  ;;  %v1176_v52 = vmax.f32 %v3653_v57, 0.0  ;;  %v1189_v17 = vmax.f32 %v912_v42, 0.0 }
 0x169   : > { %1747 = vmatpush1.bf16.msra.mxu0 %v1357_v36  ;;  %1820 = vmatpush1.bf16.msra.mxu1 %v1359_v3  ;;  %v1325_v19 = vpack.c.bf16 %v1221_v46, %v1205_v16  ;;  %v1191_v7 = vmax.f32 %v985_v51, 0.0  ;;  %v1310_v5 = vpack.c.bf16 %v1190_v13, %v1174_v2  ;;  %v1173_v24 = vmax.f32 %v908_v48, 0.0 }
 0x16a   : > { %1748 = vmatprep.subr.bf16.mxu0 %v1342_v29  ;;  %v3732_v30 = vpop.f32.mrf.mxu0  ;;  %1821 = vmatprep.subr.bf16.mxu1 %v1344_v37  ;;  %v3738_v38 = vpop.f32.mrf.mxu1  ;;  %v1327_v20 = vpack.c.bf16 %v1223_v35, %v1207_v50  ;;  %v1312_v36 = vpack.c.bf16 %v1192_v27, %v1176_v52  ;;  %v1175_v57 = vmax.f32 %v981_v14, 0.0  ;;  %v3766_v46 = vadd.f32 %v3702_v21, %v3400_v55 }
 0x16b   : > { %1654 = vmatprep.mubr.bf16.mxu0 %v2998_v0  ;;  %1727 = vmatprep.mubr.bf16.mxu1 %v2998_v0  ;;  %v1309_v29 = vpack.c.bf16 %v1189_v17, %v1173_v24  ;;  %v3774_v13 = vadd.f32 %v3720_v4, %v3408_v59 }
 0x16c   : > { %v1065_v62 = vpop.f32.mrf.mxu0  ;;  %v1138_v28 = vpop.f32.mrf.mxu1  ;;  %v1311_v32 = vpack.c.bf16 %v1191_v7, %v1175_v57 }
 0x16d   : > { %1749 = vmatpush1.bf16.msra.mxu0 %v1341_v53  ;;  %1822 = vmatpush1.bf16.msra.mxu1 %v1343_v56  ;;  %v3770_v53 = vadd.f32 %v3705_v15, %v3400_v55  ;;  %v3781_v56 = vadd.f32 %v1065_v62, %v3396_v47  ;;  %v3784_v48 = vadd.f32 %v1138_v28, %v3396_v47 }
 0x16e   : > { %1750 = vmatprep.subr.bf16.mxu0 %v1326_v18  ;;  %v1067_v45 = vpop.f32.mrf.mxu0  ;;  %1823 = vmatprep.subr.bf16.mxu1 %v1328_v25  ;;  %v3750_v60 = vpop.f32.mrf.mxu1  ;;  %v3778_v18 = vadd.f32 %v3725_v34, %v3408_v59 }
 0x16f   : > { %v3787_v21 = vadd.f32 %v1067_v45, %v3398_v49 }
 0x170   : > { %2799 = vmatmul.mubr.msk.bf16.gmra.mxu0 %vm1433_vm1, %v3621_v9  ;;  %2803 = vmatmul.mubr.msk.bf16.gmra.mxu1 %vm1433_vm1, %v3621_v9  ;;  %v1069_v58 = vpop.f32.mrf.mxu0  ;;  %v1142_v8 = vpop.f32.mrf.mxu1 }
 0x171   : > { %1751 = vmatpush1.bf16.msra.mxu0 %v1325_v19  ;;  %1770 = vmatprep.mubr.bf16.mxu0 %v2998_v0  ;;  %v3790_v27 = vadd.f32 %v1069_v58, %v3398_v49  ;;  %v3793_v4 = vadd.f32 %v1142_v8, %v3398_v49 }
 0x172   : > { %1824 = vmatpush1.bf16.msra.mxu1 %v1327_v20  ;;  %1752 = vmatprep.subr.bf16.mxu0 %v1310_v5  ;;  %v1073_v26 = vpop.f32.mrf.mxu0  ;;  %v1146_v3 = vpop.f32.mrf.mxu1 }
 0x173   : > { %1825 = vmatprep.subr.bf16.mxu1 %v1312_v36  ;;  %1843 = vmatprep.mubr.bf16.mxu1 %v2998_v0 }
 0x174   : > { %v1075_v54 = vpop.f32.mrf.mxu0  ;;  %v1148_v1 = vpop.f32.mrf.mxu1 }
 0x175   : > { %1753 = vmatpush1.bf16.msra.mxu0 %v1309_v29  ;;  %v1076_v62 = vadd.f32 %v1075_v54, %v3386_v33  ;;  %v1149_v7 = vadd.f32 %v1148_v1, %v3386_v33 }
 0x176   : > { %1826 = vmatpush1.bf16.msra.mxu1 %v1311_v32  ;;  %v1077_v37 = vpop.f32.mrf.mxu0  ;;  %v1150_v42 = vpop.f32.mrf.mxu1 }
 0x177   : > { %v1078_v5 = vadd.f32 %v1077_v37, %v3394_v41  ;;  %v1151_v24 = vadd.f32 %v1150_v42, %v3394_v41  ;;  %v1244_v42 = vmax.f32 %v1149_v7, 0.0 }
 0x178   : > { %2804 = vmatmul.mubr.msk.bf16.vlgmr.msra.gmra.mxu0 %vm1433_vm1, %v3502_v12  ;;  %v1079_v6 = vpop.f32.mrf.mxu0  ;;  %v1152_v40 = vpop.f32.mrf.mxu1 }
 0x179   : > { %2808 = vmatmul.mubr.msk.bf16.vlgmr.msra.gmra.mxu1 %vm1433_vm1, %v3502_v12  ;;  %1780 = vmatprep.mubr.bf16.mxu0 %v2998_v0  ;;  %v1080_v28 = vadd.f32 %v1079_v6, %v3394_v41  ;;  %v1153_v45 = vadd.f32 %v1152_v40, %v3394_v41  ;;  %v1074_v40 = vadd.f32 %v1073_v26, %v3386_v33 }
 0x17a   : > { %v1083_v61 = vpop.f32.mrf.mxu0  ;;  %1853 = vmatprep.mubr.bf16.mxu1 %v2998_v0  ;;  %v1156_v51 = vpop.f32.mrf.mxu1  ;;  %v1141_v41 = vadd.f32 %v3750_v60, %v3398_v49  ;;  %v1058_v60 = vadd.f32 %v3709_v63, %v3408_v59  ;;  %v1194_v63 = vmax.f32 %v3774_v13, 0.0  ;;  %v1180_v13 = vmax.f32 %v3770_v53, 0.0 }
 0x17b   : > { %v1084_v52 = vadd.f32 %v1083_v61, %v3384_v31  ;;  %v1157_v20 = vadd.f32 %v1156_v51, %v3384_v31  ;;  %v1258_v29 = vmax.f32 %v1080_v28, 0.0  ;;  %v1260_v1 = vmax.f32 %v1153_v45, 0.0 }
 0x17c   : > { %v1085_v11 = vpop.f32.mrf.mxu0  ;;  %v1158_v35 = vpop.f32.mrf.mxu1  ;;  %v1242_v51 = vmax.f32 %v1076_v62, 0.0  ;;  %v1241_v62 = vmax.f32 %v1074_v40, 0.0  ;;  %v1210_v28 = vmax.f32 %v3781_v56, 0.0  ;;  %v1227_v45 = vmax.f32 %v1141_v41, 0.0 }
 0x17d   : > { %v1086_v16 = vadd.f32 %v1085_v11, %v3384_v31  ;;  %v1159_v14 = vadd.f32 %v1158_v35, %v3384_v31  ;;  %v1273_v61 = vmax.f32 %v1084_v52, 0.0  ;;  %v1147_v31 = vadd.f32 %v1146_v3, %v3386_v33 }
 0x17e   : > { %v1087_v15 = vpop.f32.mrf.mxu0  ;;  %v1160_v25 = vpop.f32.mrf.mxu1  ;;  %v1257_v35 = vmax.f32 %v1078_v5, 0.0  ;;  %v1064_v33 = vadd.f32 %v3732_v30, %v3396_v47  ;;  %v1228_v3 = vmax.f32 %v3793_v4, 0.0  ;;  %v1348_v49 = vpack.c.bf16 %v1260_v1, %v1244_v42 }
 0x17f   : > { %v1088_v34 = vadd.f32 %v1087_v15, %v3392_v39  ;;  %v1161_v2 = vadd.f32 %v1160_v25, %v3392_v39  ;;  %v1274_v36 = vmax.f32 %v1086_v16, 0.0  ;;  %v1276_v32 = vmax.f32 %v1159_v14, 0.0 }
 0x180   : > { %2805 = vmatmul.mubr.msk.bf16.gmra.mxu0 %vm1433_vm1, %v3513_v22  ;;  %v1089_v50 = vpop.f32.mrf.mxu0  ;;  %v1162_v19 = vpop.f32.mrf.mxu1  ;;  %v1226_v16 = vmax.f32 %v3790_v27, 0.0  ;;  %v1346_v25 = vpack.c.bf16 %v1258_v29, %v1242_v51  ;;  %v1137_v27 = vadd.f32 %v3738_v38, %v3396_v47  ;;  %v1243_v14 = vmax.f32 %v1147_v31, 0.0 }
 0x181   : > { %2809 = vmatmul.mubr.msk.bf16.gmra.mxu1 %vm1433_vm1, %v3513_v22  ;;  %v1090_v17 = vadd.f32 %v1089_v50, %v3392_v39  ;;  %1790 = vmatprep.mubr.bf16.mxu0 %v2998_v0  ;;  %v1163_v58 = vadd.f32 %v1162_v19, %v3392_v39  ;;  %v1289_v8 = vmax.f32 %v1088_v34, 0.0  ;;  %v1291_v54 = vmax.f32 %v1161_v2, 0.0 }
 0x182   : > { %1863 = vmatprep.mubr.bf16.mxu1 %v2998_v0  ;;  %v1275_v39 = vmax.f32 %v1157_v20, 0.0  ;;  %v1259_v34 = vmax.f32 %v1151_v24, 0.0  ;;  %v1131_v30 = vadd.f32 %v3713_v43, %v3408_v59  ;;  %v1212_v4 = vmax.f32 %v3784_v48, 0.0 }
 0x183   : > { %v1290_v57 = vmax.f32 %v1090_v17, 0.0  ;;  %v1292_v6 = vmax.f32 %v1163_v58, 0.0  ;;  %v1361_v15 = vpack.c.bf16 %v1289_v8, %v1273_v61  ;;  %v1225_v2 = vmax.f32 %v3787_v21, 0.0 }
 0x184   : > { %v1363_v26 = vpack.c.bf16 %v1291_v54, %v1275_v39  ;;  %v1345_v50 = vpack.c.bf16 %v1257_v35, %v1241_v62  ;;  %v1330_v47 = vpack.c.bf16 %v1226_v16, %v1210_v28  ;;  %v1347_v38 = vpack.c.bf16 %v1259_v34, %v1243_v14 }
 0x185   : > { %v1362_v37 = vpack.c.bf16 %v1290_v57, %v1274_v36  ;;  %v1364_v11 = vpack.c.bf16 %v1292_v6, %v1276_v32  ;;  %v1054_v56 = vadd.f32 %v3697_v23, %v3400_v55  ;;  %v1196_v59 = vmax.f32 %v3778_v18, 0.0  ;;  %v3884_v57 = vpop.permute.xlu0 %1405  ;;  %v3886_v32 = vpop.permute.xlu1 %1410 }
 0x186   : > { %v1209_v43 = vmax.f32 %v1064_v33, 0.0  ;;  %v1332_v48 = vpack.c.bf16 %v1228_v3, %v1212_v4  ;;  %v1127_v21 = vadd.f32 %v3700_v44, %v3400_v55  ;;  %v1178_v52 = vmax.f32 %v3766_v46, 0.0 }
 0x187   : > { %1892 = vmatprep.subr.bf16.mxu0 %v1362_v37  ;;  %1965 = vmatprep.subr.bf16.mxu1 %v1364_v11  ;;  %v1211_v17 = vmax.f32 %v1137_v27, 0.0  ;;  %v1193_v19 = vmax.f32 %v1058_v60, 0.0  ;;  %v1195_v5 = vmax.f32 %v1131_v30, 0.0  ;;  %v1177_v18 = vmax.f32 %v1054_v56, 0.0 }
 0x188   : > { %2806 = vmatmul.mubr.msk.bf16.gmra.mxu0 %vm1433_vm1, %v3576_v10  ;;  %1966 = vmatpush1.bf16.msra.mxu1 %v1363_v26  ;;  %v1329_v7 = vpack.c.bf16 %v1225_v2, %v1209_v43  ;;  %v1314_v23 = vpack.c.bf16 %v1194_v63, %v1178_v52  ;;  %v1316_v58 = vpack.c.bf16 %v1196_v59, %v1180_v13  ;;  %v1179_v55 = vmax.f32 %v1127_v21, 0.0 }
 0x189   : > { %2810 = vmatmul.mubr.msk.bf16.gmra.mxu1 %vm1433_vm1, %v3576_v10  ;;  %1893 = vmatpush1.bf16.msra.mxu0 %v1361_v15  ;;  %v1331_v20 = vpack.c.bf16 %v1227_v45, %v1211_v17  ;;  %v1313_v44 = vpack.c.bf16 %v1193_v19, %v1177_v18  ;;  %v3892_v61 = vpop.permute.xlu0 %1395  ;;  %v3894_v31 = vpop.permute.xlu1 %1400 }
 0x18a   : > { %1894 = vmatprep.subr.bf16.mxu0 %v1346_v25  ;;  %1967 = vmatprep.subr.bf16.mxu1 %v1348_v49  ;;  %v1315_v46 = vpack.c.bf16 %v1195_v5, %v1179_v55 }
 0x18b   : > { %1800 = vmatprep.mubr.bf16.mxu0 %v2998_v0  ;;  %1873 = vmatprep.mubr.bf16.mxu1 %v2998_v0 }
 0x18c   : > { %1968 = vmatpush1.bf16.msra.mxu1 %v1347_v38 }
 0x18d   : > { %1895 = vmatpush1.bf16.msra.mxu0 %v1345_v50  ;;  %1969 = vmatprep.subr.bf16.mxu1 %v1332_v48  ;;  %v3896_v35 = vpop.permute.xlu0 %1385  ;;  %v3898_v16 = vpop.permute.xlu1 %1390 }
 0x18e   : > { %1896 = vmatprep.subr.bf16.mxu0 %v1330_v47 }
 0x190   : > { %2807 = vmatmul.mubr.msk.bf16.gmra.mxu0 %vm1433_vm1, %v3621_v9  ;;  %1970 = vmatpush1.bf16.msra.mxu1 %v1331_v20 }
 0x191   : > { %2811 = vmatmul.mubr.msk.bf16.gmra.mxu1 %vm1433_vm1, %v3621_v9  ;;  %1897 = vmatpush1.bf16.msra.mxu0 %v1329_v7  ;;  %v3900_v62 = vpop.permute.xlu0 %1375  ;;  %v3902_v60 = vpop.permute.xlu1 %1380 }
 0x192   : > { %1898 = vmatprep.subr.bf16.mxu0 %v1314_v23  ;;  %1971 = vmatprep.subr.bf16.mxu1 %v1316_v58 }
 0x193   : > { %1916 = vmatprep.mubr.bf16.mxu0 %v2998_v0  ;;  %1989 = vmatprep.mubr.bf16.mxu1 %v2998_v0 }
 0x194   : > { %1972 = vmatpush1.bf16.msra.mxu1 %v1315_v46 }
 0x195   : > { %1899 = vmatpush1.bf16.msra.mxu0 %v1313_v44 }
 0x198   : > { %2812 = vmatmul.mubr.msk.bf16.vlgmr.msra.gmra.mxu0 %vm1433_vm1, %v3502_v12 }
 0x199   : > { %2816 = vmatmul.mubr.msk.bf16.vlgmr.msra.gmra.mxu1 %vm1433_vm1, %v3502_v12  ;;  %1926 = vmatprep.mubr.bf16.mxu0 %v2998_v0 }
 0x19a   : > { %1999 = vmatprep.mubr.bf16.mxu1 %v2998_v0 }
 0x1a0   : > { %2813 = vmatmul.mubr.msk.bf16.gmra.mxu0 %vm1433_vm1, %v3513_v22 }
 0x1a1   : > { %2817 = vmatmul.mubr.msk.bf16.gmra.mxu1 %vm1433_vm1, %v3513_v22  ;;  %1936 = vmatprep.mubr.bf16.mxu0 %v2998_v0 }
 0x1a2   : > { %2009 = vmatprep.mubr.bf16.mxu1 %v2998_v0 }
 0x1a8   : > { %2814 = vmatmul.mubr.msk.bf16.gmra.mxu0 %vm1433_vm1, %v3576_v10 }
 0x1a9   : > { %2818 = vmatmul.mubr.msk.bf16.gmra.mxu1 %vm1433_vm1, %v3576_v10  ;;  %1946 = vmatprep.mubr.bf16.mxu0 %v2998_v0 }
 0x1aa   : > { %2019 = vmatprep.mubr.bf16.mxu1 %v2998_v0 }
 0x1b0   : > { %2815 = vmatmul.mubr.msk.bf16.gmra.mxu0 %vm1433_vm1, %v3621_v9 }
 0x1b1   : > { %2819 = vmatmul.mubr.msk.bf16.gmra.mxu1 %vm1433_vm1, %v3621_v9  ;;  %2276 = vmatprep.mubr.bf16.mxu0 %v2998_v0 }
 0x1b2   : > { %2319 = vmatprep.mubr.bf16.mxu1 %v2998_v0 }
 0x1f7   : > { %v3876_v12 = vpop.f32.mrf.mxu0  ;;  %v3878_v22 = vpop.f32.mrf.mxu1 }
 0x1f9   : > { %v1482_v53 = vpop.f32.mrf.mxu0  ;;  %v1555_v10 = vpop.f32.mrf.mxu1 }
 0x1fa   : > { %v3905_v27 = vadd.f32 %v1482_v53, %v3900_v62  ;;  %v3908_v28 = vadd.f32 %v1555_v10, %v3900_v62 }
 0x1fb   : > { %v3880_v24 = vpop.f32.mrf.mxu0  ;;  %v3882_v36 = vpop.f32.mrf.mxu1 }
 0x1fd   : > { %v1486_v8 = vpop.f32.mrf.mxu0  ;;  %v1559_v29 = vpop.f32.mrf.mxu1 }
 0x1fe   : > { %v3911_v30 = vadd.f32 %v1486_v8, %v3902_v60  ;;  %v3914_v4 = vadd.f32 %v1559_v29, %v3902_v60 }
 0x1ff   : > { %v3888_v9 = vpop.f32.mrf.mxu0  ;;  %v3890_v54 = vpop.f32.mrf.mxu1 }
 0x201   : > { %v1492_v6 = vpop.f32.mrf.mxu0  ;;  %v1565_v40 = vpop.f32.mrf.mxu1 }
 0x202   : > { %v3917_v2 = vadd.f32 %v1492_v6, %v3896_v35  ;;  %v3920_v50 = vadd.f32 %v1565_v40, %v3896_v35 }
 0x203   : > { %v1494_v1 = vpop.f32.mrf.mxu0  ;;  %v1567_v37 = vpop.f32.mrf.mxu1 }
 0x204   : > { %v3923_v45 = vadd.f32 %v1494_v1, %v3898_v16  ;;  %v3926_v47 = vadd.f32 %v1567_v37, %v3898_v16 }
 0x205   : > { %v1496_v51 = vpop.f32.mrf.mxu0  ;;  %v1569_v39 = vpop.f32.mrf.mxu1 }
 0x206   : > { %v3929_v38 = vadd.f32 %v1496_v51, %v3898_v16  ;;  %v3932_v56 = vadd.f32 %v1569_v39, %v3898_v16 }
 0x207   : > { %v1500_v11 = vpop.f32.mrf.mxu0 }
 0x208   : > { %v1573_v41 = vpop.f32.mrf.mxu1  ;;  %v3935_v43 = vadd.f32 %v1500_v11, %v3892_v61 }
 0x209   : > { %v1502_v42 = vpop.f32.mrf.mxu0 }
 0x20a   : > { %v1575_v15 = vpop.f32.mrf.mxu1  ;;  %v1503_v20 = vadd.f32 %v1502_v42, %v3892_v61 }
 0x20b   : > { %v1504_v34 = vpop.f32.mrf.mxu0  ;;  %v1576_v18 = vadd.f32 %v1575_v15, %v3892_v61 }
 0x20c   : > { %v1577_v25 = vpop.f32.mrf.mxu1  ;;  %v1505_v46 = vadd.f32 %v1504_v34, %v3894_v31  ;;  %v2095_v34 = vmax.f32 %v1503_v20, 0.0 }
 0x20d   : > { %v1506_v26 = vpop.f32.mrf.mxu0  ;;  %v1578_v53 = vadd.f32 %v1577_v25, %v3894_v31 }
 0x20e   : > { %v1579_v33 = vpop.f32.mrf.mxu1  ;;  %v1507_v48 = vadd.f32 %v1506_v26, %v3894_v31  ;;  %v1574_v26 = vadd.f32 %v1573_v41, %v3892_v61  ;;  %v1491_v41 = vadd.f32 %v3888_v9, %v3896_v35  ;;  %v1558_v9 = vadd.f32 %v3882_v36, %v3902_v60 }
 0x20f   : > { %v1510_v3 = vpop.f32.mrf.mxu0  ;;  %v1580_v13 = vadd.f32 %v1579_v33, %v3894_v31  ;;  %v2049_v36 = vmax.f32 %v3914_v4, 0.0 }
 0x210   : > { %v1583_v49 = vpop.f32.mrf.mxu1  ;;  %v1511_v19 = vadd.f32 %v1510_v3, %v3884_v57  ;;  %v2111_v29 = vmax.f32 %v1507_v48, 0.0 }
 0x211   : > { %v1512_v14 = vpop.f32.mrf.mxu0  ;;  %v1584_v58 = vadd.f32 %v1583_v49, %v3884_v57  ;;  %v2113_v39 = vmax.f32 %v1580_v13, 0.0 }
 0x212   : > { %v1585_v63 = vpop.f32.mrf.mxu1  ;;  %v1513_v21 = vadd.f32 %v1512_v14, %v3884_v57  ;;  %v2126_v11 = vmax.f32 %v1511_v19, 0.0  ;;  %v2097_v14 = vmax.f32 %v1576_v18, 0.0  ;;  %v1564_v18 = vadd.f32 %v3890_v54, %v3896_v35 }
 0x213   : > { %v1514_v59 = vpop.f32.mrf.mxu0  ;;  %v1586_v7 = vadd.f32 %v1585_v63, %v3884_v57  ;;  %v2128_v33 = vmax.f32 %v1584_v58, 0.0  ;;  %v2110_v63 = vmax.f32 %v1505_v46, 0.0  ;;  %v2063_v58 = vmax.f32 %v3917_v2, 0.0 }
 0x214   : > { %v1515_v52 = vadd.f32 %v1514_v59, %v3886_v32  ;;  %v1587_v17 = vpop.f32.mrf.mxu1  ;;  %v2127_v6 = vmax.f32 %v1513_v21, 0.0  ;;  %v2079_v21 = vmax.f32 %v3929_v38, 0.0  ;;  %v2195_v20 = vpack.c.bf16 %v2113_v39, %v2097_v14 }
 0x215   : > { %v1588_v5 = vadd.f32 %v1587_v17, %v3886_v32  ;;  %v1516_v23 = vpop.f32.mrf.mxu0  ;;  %v2129_v42 = vmax.f32 %v1586_v7, 0.0  ;;  %v2193_v17 = vpack.c.bf16 %v2111_v29, %v2095_v34  ;;  %v1485_v38 = vadd.f32 %v3880_v24, %v3902_v60 }
 0x216   : > { %v1517_v55 = vadd.f32 %v1516_v23, %v3886_v32  ;;  %v1589_v44 = vpop.f32.mrf.mxu1  ;;  %v2142_v10 = vmax.f32 %v1515_v52, 0.0  ;;  %v2112_v52 = vmax.f32 %v1578_v53, 0.0  ;;  %v2094_v23 = vmax.f32 %v3935_v43, 0.0 }
 0x217   : > { %v1590_v8 = vadd.f32 %v1589_v44, %v3886_v32  ;;  %v2144_v40 = vmax.f32 %v1588_v5, 0.0  ;;  %v2081_v5 = vmax.f32 %v3932_v56, 0.0  ;;  %v2065_v56 = vmax.f32 %v3920_v50, 0.0 }
 0x218   : > { %v2143_v1 = vmax.f32 %v1517_v55, 0.0  ;;  %v3951_v37 = vpop.f32.mrf.mxu0  ;;  %v3953_v51 = vpop.f32.mrf.mxu1  ;;  %v2208_v59 = vpack.c.bf16 %v2142_v10, %v2126_v11  ;;  %v2096_v55 = vmax.f32 %v1574_v26, 0.0  ;;  %v2078_v43 = vmax.f32 %v3923_v45, 0.0 }
 0x219   : > { %v2145_v15 = vmax.f32 %v1590_v8, 0.0  ;;  %v2210_v13 = vpack.c.bf16 %v2144_v40, %v2128_v33  ;;  %v2192_v24 = vpack.c.bf16 %v2110_v63, %v2094_v23  ;;  %v2047_v54 = vmax.f32 %v3911_v30, 0.0 }
 0x21a   : > { %v2209_v25 = vpack.c.bf16 %v2143_v1, %v2127_v6  ;;  %v3956_v3 = vpop.f32.mrf.mxu0  ;;  %v3958_v49 = vpop.f32.mrf.mxu1  ;;  %v2080_v2 = vmax.f32 %v3926_v47, 0.0  ;;  %v2177_v53 = vpack.c.bf16 %v2079_v21, %v2063_v58  ;;  %v2194_v10 = vpack.c.bf16 %v2112_v52, %v2096_v55  ;;  %v3998_v52 = vld [vmem:[%s4408_s5] sm:$0x1f]  }
 0x21b   : > { %v2211_v48 = vpack.c.bf16 %v2145_v15, %v2129_v42  ;;  %v1481_v6 = vadd.f32 %v3876_v12, %v3900_v62  ;;  %v2062_v50 = vmax.f32 %v1491_v41, 0.0  ;;  %v2179_v40 = vpack.c.bf16 %v2081_v5, %v2065_v56 }
 0x21c   : > { %v3961_v19 = vpop.f32.mrf.mxu0  ;;  %v3963_v7 = vpop.f32.mrf.mxu1  ;;  %2252 = vmatprep.subr.bf16.mxu0 %v2209_v25  ;;  %v1554_v45 = vadd.f32 %v3878_v22, %v3900_v62  ;;  %v2031_v30 = vmax.f32 %v3905_v27, 0.0  ;;  %v2064_v47 = vmax.f32 %v1564_v18, 0.0  ;;  %v2033_v11 = vmax.f32 %v3908_v28, 0.0 }
 0x21d   : > { %2295 = vmatprep.subr.bf16.mxu1 %v2211_v48  ;;  %2253 = vmatpush1.bf16.msra.mxu0 %v2208_v59  ;;  %v2046_v42 = vmax.f32 %v1485_v38, 0.0  ;;  %v2176_v15 = vpack.c.bf16 %v2078_v43, %v2062_v50  ;;  %v2048_v12 = vmax.f32 %v1558_v9, 0.0  ;;  %v2030_v25 = vmax.f32 %v1481_v6, 0.0 }
 0x21e   : > { %v3974_v44 = vpop.f32.mrf.mxu0  ;;  %v3976_v46 = vpop.f32.mrf.mxu1  ;;  %2296 = vmatpush1.bf16.msra.mxu1 %v2210_v13  ;;  %2254 = vmatprep.subr.bf16.mxu0 %v2193_v17  ;;  %v2161_v4 = vpack.c.bf16 %v2047_v54, %v2031_v30  ;;  %v2178_v26 = vpack.c.bf16 %v2080_v2, %v2064_v47  ;;  %v2163_v14 = vpack.c.bf16 %v2049_v36, %v2033_v11  ;;  %v2032_v22 = vmax.f32 %v1554_v45, 0.0 }
 0x21f   : > { %2297 = vmatprep.subr.bf16.mxu1 %v2195_v20  ;;  %v2160_v59 = vpack.c.bf16 %v2046_v42, %v2030_v25  ;;  %v4008_v58 = vadd.f32 %v3956_v3, %v3900_v62  ;;  %v4012_v55 = vadd.f32 %v3958_v49, %v3900_v62  ;;  %v4016_v9 = vadd.f32 %v3974_v44, %v3902_v60 }
 0x220   : > { %v3984_v8 = vpop.f32.mrf.mxu0  ;;  %v3986_v29 = vpop.f32.mrf.mxu1  ;;  %v2162_v48 = vpack.c.bf16 %v2048_v12, %v2032_v22  ;;  %v4020_v56 = vadd.f32 %v3976_v46, %v3902_v60 }
 0x221   : > { %2255 = vmatpush1.bf16.msra.mxu0 %v2192_v24 }
 0x222   : > { %v1638_v1 = vpop.f32.mrf.mxu0  ;;  %v1711_v39 = vpop.f32.mrf.mxu1  ;;  %2298 = vmatpush1.bf16.msra.mxu1 %v2194_v10  ;;  %2256 = vmatprep.subr.bf16.mxu0 %v2177_v53 }
 0x223   : > { %2299 = vmatprep.subr.bf16.mxu1 %v2179_v40  ;;  %v4023_v54 = vadd.f32 %v1638_v1, %v3896_v35  ;;  %v4026_v3 = vadd.f32 %v1711_v39, %v3896_v35 }
 0x224   : > { %v1640_v34 = vpop.f32.mrf.mxu0  ;;  %v1713_v33 = vpop.f32.mrf.mxu1 }
 0x225   : > { %2257 = vmatpush1.bf16.msra.mxu0 %v2176_v15  ;;  %v4029_v2 = vadd.f32 %v1640_v34, %v3898_v16  ;;  %v4032_v49 = vadd.f32 %v1713_v33, %v3898_v16 }
 0x226   : > { %v1642_v27 = vpop.f32.mrf.mxu0  ;;  %v1715_v63 = vpop.f32.mrf.mxu1  ;;  %2300 = vmatpush1.bf16.msra.mxu1 %v2178_v26  ;;  %2258 = vmatprep.subr.bf16.mxu0 %v2161_v4 }
 0x227   : > { %2301 = vmatprep.subr.bf16.mxu1 %v2163_v14  ;;  %v4035_v44 = vadd.f32 %v1642_v27, %v3898_v16  ;;  %v4038_v46 = vadd.f32 %v1715_v63, %v3898_v16 }
 0x228   : > { %v1646_v28 = vpop.f32.mrf.mxu0  ;;  %v1719_v21 = vpop.f32.mrf.mxu1 }
 0x229   : > { %2259 = vmatpush1.bf16.msra.mxu0 %v2160_v59 }
 0x22a   : > { %v1648_v17 = vpop.f32.mrf.mxu0  ;;  %v1721_v13 = vpop.f32.mrf.mxu1  ;;  %2302 = vmatpush1.bf16.msra.mxu1 %v2162_v48 }
 0x22b   : > { %v1649_v47 = vadd.f32 %v1648_v17, %v3892_v61  ;;  %v1722_v1 = vadd.f32 %v1721_v13, %v3892_v61 }
 0x22c   : > { %v1650_v41 = vpop.f32.mrf.mxu0  ;;  %v1723_v5 = vpop.f32.mrf.mxu1  ;;  %2821 = vmatmul.mubr.msk.bf16.vlgmr.msra.gmra.mxu0 %vm1433_vm1, %v3998_v52 }
 0x22d   : > { %2822 = vmatmul.mubr.msk.bf16.vlgmr.msra.gmra.mxu1 %vm1433_vm1, %v3998_v52  ;;  %2362 = vmatprep.mubr.bf16.mxu0 %v2998_v0  ;;  %v1651_v12 = vadd.f32 %v1650_v41, %v3894_v31  ;;  %v1724_v4 = vadd.f32 %v1723_v5, %v3894_v31  ;;  %v1647_v41 = vadd.f32 %v1646_v28, %v3892_v61  ;;  %v2083_v28 = vmax.f32 %v4035_v44, 0.0 }
 0x22e   : > { %v1652_v23 = vpop.f32.mrf.mxu0  ;;  %v1725_v20 = vpop.f32.mrf.mxu1  ;;  %2405 = vmatprep.mubr.bf16.mxu1 %v2998_v0  ;;  %v1720_v5 = vadd.f32 %v1719_v21, %v3892_v61  ;;  %v2085_v21 = vmax.f32 %v4038_v46, 0.0  ;;  %v1631_v44 = vadd.f32 %v3961_v19, %v3902_v60  ;;  %v1704_v46 = vadd.f32 %v3963_v7, %v3902_v60 }
 0x22f   : > { %v1653_v53 = vadd.f32 %v1652_v23, %v3894_v31  ;;  %v1726_v10 = vadd.f32 %v1725_v20, %v3894_v31  ;;  %v2051_v19 = vmax.f32 %v4016_v9, 0.0  ;;  %v2053_v7 = vmax.f32 %v4020_v56, 0.0 }
 0x230   : > { %v1656_v38 = vpop.f32.mrf.mxu0  ;;  %v1729_v18 = vpop.f32.mrf.mxu1  ;;  %v2037_v9 = vmax.f32 %v4012_v55, 0.0 }
 0x231   : > { %v1657_v39 = vadd.f32 %v1656_v38, %v3884_v57  ;;  %v1730_v11 = vadd.f32 %v1729_v18, %v3884_v57  ;;  %v2115_v33 = vmax.f32 %v1653_v53, 0.0  ;;  %v2117_v25 = vmax.f32 %v1726_v10, 0.0 }
 0x232   : > { %v1658_v43 = vpop.f32.mrf.mxu0  ;;  %v1731_v24 = vpop.f32.mrf.mxu1  ;;  %v2099_v18 = vmax.f32 %v1649_v47, 0.0  ;;  %v1637_v47 = vadd.f32 %v3984_v8, %v3896_v35 }
 0x233   : > { %v1659_v50 = vadd.f32 %v1658_v43, %v3884_v57  ;;  %v1732_v40 = vadd.f32 %v1731_v24, %v3884_v57  ;;  %v2130_v23 = vmax.f32 %v1657_v39, 0.0  ;;  %v2132_v20 = vmax.f32 %v1730_v11, 0.0 }
 0x234   : > { %v1660_v6 = vpop.f32.mrf.mxu0  ;;  %v1733_v36 = vpop.f32.mrf.mxu1  ;;  %v2101_v43 = vmax.f32 %v1722_v1, 0.0  ;;  %v1710_v1 = vadd.f32 %v3986_v29, %v3896_v35  ;;  %v2082_v29 = vmax.f32 %v4029_v2, 0.0  ;;  %v1700_v2 = vadd.f32 %v3953_v51, %v3900_v62 }
 0x235   : > { %v1661_v45 = vadd.f32 %v1660_v6, %v3886_v32  ;;  %v1734_v30 = vadd.f32 %v1733_v36, %v3886_v32  ;;  %v2131_v63 = vmax.f32 %v1659_v50, 0.0  ;;  %v2133_v59 = vmax.f32 %v1732_v40, 0.0 }
 0x236   : > { %v1662_v42 = vpop.f32.mrf.mxu0  ;;  %v1735_v15 = vpop.f32.mrf.mxu1  ;;  %v2114_v6 = vmax.f32 %v1651_v12, 0.0  ;;  %v2116_v36 = vmax.f32 %v1724_v4, 0.0  ;;  %v2199_v39 = vpack.c.bf16 %v2117_v25, %v2101_v43  ;;  %v2067_v4 = vmax.f32 %v4023_v54, 0.0 }
 0x237   : > { %v1663_v26 = vadd.f32 %v1662_v42, %v3886_v32  ;;  %v1736_v34 = vadd.f32 %v1735_v15, %v3886_v32  ;;  %v2146_v14 = vmax.f32 %v1661_v45, 0.0  ;;  %v2148_v22 = vmax.f32 %v1734_v30, 0.0 }
 0x238   : > { %v4054_v27 = vpop.f32.mrf.mxu0  ;;  %v2197_v30 = vpack.c.bf16 %v2115_v33, %v2099_v18  ;;  %v2098_v42 = vmax.f32 %v1647_v41, 0.0  ;;  %v2100_v15 = vmax.f32 %v1720_v5, 0.0  ;;  %v2050_v41 = vmax.f32 %v1631_v44, 0.0 }
 0x239   : > { %v2147_v48 = vmax.f32 %v1663_v26, 0.0  ;;  %v2149_v17 = vmax.f32 %v1736_v34, 0.0  ;;  %v4056_v13 = vpop.f32.mrf.mxu1  ;;  %v2212_v50 = vpack.c.bf16 %v2146_v14, %v2130_v23  ;;  %v2214_v40 = vpack.c.bf16 %v2148_v22, %v2132_v20 }
 0x23a   : > { %v4060_v38 = vpop.f32.mrf.mxu0  ;;  %v2069_v26 = vmax.f32 %v4026_v3, 0.0  ;;  %v2084_v34 = vmax.f32 %v4032_v49, 0.0  ;;  %v2196_v33 = vpack.c.bf16 %v2114_v6, %v2098_v42  ;;  %v2198_v25 = vpack.c.bf16 %v2116_v36, %v2100_v15 }
 0x23b   : > { %v2213_v24 = vpack.c.bf16 %v2147_v48, %v2131_v63  ;;  %v2215_v53 = vpack.c.bf16 %v2149_v17, %v2133_v59  ;;  %v4062_v10 = vpop.f32.mrf.mxu1  ;;  %v2181_v22 = vpack.c.bf16 %v2083_v28, %v2067_v4  ;;  %v1627_v3 = vadd.f32 %v3951_v37, %v3900_v62 }
 0x23c   : > { %v4064_v45 = vpop.f32.mrf.mxu0  ;;  %v2183_v54 = vpack.c.bf16 %v2085_v21, %v2069_v26  ;;  %v2066_v59 = vmax.f32 %v1637_v47, 0.0  ;;  %v2068_v49 = vmax.f32 %v1710_v1, 0.0  ;;  %v2035_v17 = vmax.f32 %v4008_v58, 0.0 }
 0x23d   : > { %v4068_v11 = vpop.f32.mrf.mxu1  ;;  %2338 = vmatprep.subr.bf16.mxu0 %v2213_v24  ;;  %2381 = vmatprep.subr.bf16.mxu1 %v2215_v53  ;;  %v2052_v5 = vmax.f32 %v1704_v46, 0.0  ;;  %v2167_v43 = vpack.c.bf16 %v2053_v7, %v2037_v9  ;;  %v2034_v24 = vmax.f32 %v1627_v3, 0.0  ;;  %v2036_v53 = vmax.f32 %v1700_v2, 0.0 }
 0x23e   : > { %v4074_v12 = vpop.f32.mrf.mxu0  ;;  %2339 = vmatpush1.bf16.msra.mxu0 %v2212_v50  ;;  %2382 = vmatpush1.bf16.msra.mxu1 %v2214_v40  ;;  %v2180_v23 = vpack.c.bf16 %v2082_v29, %v2066_v59  ;;  %v2182_v20 = vpack.c.bf16 %v2084_v34, %v2068_v49  ;;  %v2165_v18 = vpack.c.bf16 %v2051_v19, %v2035_v17 }
 0x23f   : > { %v4082_v8 = vpop.f32.mrf.mxu1  ;;  %2340 = vmatprep.subr.bf16.mxu0 %v2197_v30  ;;  %2383 = vmatprep.subr.bf16.mxu1 %v2199_v39  ;;  %v2164_v58 = vpack.c.bf16 %v2050_v41, %v2034_v24  ;;  %v2166_v55 = vpack.c.bf16 %v2052_v5, %v2036_v53  ;;  %v4106_v44 = vadd.f32 %v4060_v38, %v3900_v62 }
 0x240   : > { %v4086_v14 = vpop.f32.mrf.mxu0  ;;  %v4110_v46 = vadd.f32 %v4062_v10, %v3900_v62  ;;  %v4114_v26 = vadd.f32 %v4074_v12, %v3902_v60  ;;  %v4118_v29 = vadd.f32 %v4082_v8, %v3902_v60 }
 0x241   : > { %v4090_v63 = vpop.f32.mrf.mxu1 }
 0x242   : > { %v1784_v48 = vpop.f32.mrf.mxu0  ;;  %2341 = vmatpush1.bf16.msra.mxu0 %v2196_v33  ;;  %2384 = vmatpush1.bf16.msra.mxu1 %v2198_v25 }
 0x243   : > { %v1857_v56 = vpop.f32.mrf.mxu1  ;;  %2342 = vmatprep.subr.bf16.mxu0 %v2181_v22  ;;  %2385 = vmatprep.subr.bf16.mxu1 %v2183_v54  ;;  %v4121_v34 = vadd.f32 %v1784_v48, %v3896_v35 }
 0x244   : > { %v1786_v37 = vpop.f32.mrf.mxu0  ;;  %v4124_v33 = vadd.f32 %v1857_v56, %v3896_v35 }
 0x245   : > { %v1859_v51 = vpop.f32.mrf.mxu1  ;;  %v4127_v25 = vadd.f32 %v1786_v37, %v3898_v16 }
 0x246   : > { %v1788_v6 = vpop.f32.mrf.mxu0  ;;  %2343 = vmatpush1.bf16.msra.mxu0 %v2180_v23  ;;  %2386 = vmatpush1.bf16.msra.mxu1 %v2182_v20  ;;  %v4130_v10 = vadd.f32 %v1859_v51, %v3898_v16 }
 0x247   : > { %v1861_v36 = vpop.f32.mrf.mxu1  ;;  %2344 = vmatprep.subr.bf16.mxu0 %v2165_v18  ;;  %2387 = vmatprep.subr.bf16.mxu1 %v2167_v43  ;;  %v4133_v12 = vadd.f32 %v1788_v6, %v3898_v16 }
 0x248   : > { %v1792_v50 = vpop.f32.mrf.mxu0  ;;  %v4136_v19 = vadd.f32 %v1861_v36, %v3898_v16 }
 0x249   : > { %v1865_v40 = vpop.f32.mrf.mxu1  ;;  %v4139_v7 = vadd.f32 %v1792_v50, %v3892_v61 }
 0x24a   : > { %v1794_v28 = vpop.f32.mrf.mxu0  ;;  %2345 = vmatpush1.bf16.msra.mxu0 %v2164_v58  ;;  %2388 = vmatpush1.bf16.msra.mxu1 %v2166_v55 }
 0x24b   : > { %v1867_v21 = vpop.f32.mrf.mxu1  ;;  %v1795_v56 = vadd.f32 %v1794_v28, %v3892_v61 }
 0x24c   : > { %v1796_v30 = vpop.f32.mrf.mxu0  ;;  %v1868_v41 = vadd.f32 %v1867_v21, %v3892_v61 }
 0x24d   : > { %v1869_v39 = vpop.f32.mrf.mxu1  ;;  %2823 = vmatmul.mubr.msk.bf16.vlgmr.msra.gmra.mxu0 %vm1433_vm1, %v3998_v52  ;;  %2824 = vmatmul.mubr.msk.bf16.vlgmr.msra.gmra.mxu1 %vm1433_vm1, %v3998_v52  ;;  %v1797_v37 = vadd.f32 %v1796_v30, %v3894_v31  ;;  %v1866_v30 = vadd.f32 %v1865_v40, %v3892_v61  ;;  %v1783_v40 = vadd.f32 %v4086_v14, %v3896_v35 }
 0x24e   : > { %v1798_v47 = vpop.f32.mrf.mxu0  ;;  %2448 = vmatprep.mubr.bf16.mxu0 %v2998_v0  ;;  %2491 = vmatprep.mubr.bf16.mxu1 %v2998_v0  ;;  %v1870_v18 = vadd.f32 %v1869_v39, %v3894_v31  ;;  %v2103_v39 = vmax.f32 %v1795_v56, 0.0  ;;  %v2102_v56 = vmax.f32 %v4139_v7, 0.0  ;;  %v1850_v14 = vadd.f32 %v4068_v11, %v3902_v60 }
 0x24f   : > { %v1871_v1 = vpop.f32.mrf.mxu1  ;;  %v1799_v22 = vadd.f32 %v1798_v47, %v3894_v31  ;;  %v2086_v7 = vmax.f32 %v4127_v25, 0.0  ;;  %v2057_v11 = vmax.f32 %v4118_v29, 0.0 }
 0x250   : > { %v1802_v42 = vpop.f32.mrf.mxu0  ;;  %v1872_v59 = vadd.f32 %v1871_v1, %v3894_v31  ;;  %v2056_v29 = vmax.f32 %v1850_v14, 0.0 }
 0x251   : > { %v1875_v15 = vpop.f32.mrf.mxu1  ;;  %v1803_v49 = vadd.f32 %v1802_v42, %v3884_v57  ;;  %v2119_v53 = vmax.f32 %v1799_v22, 0.0 }
 0x252   : > { %v1804_v4 = vpop.f32.mrf.mxu0  ;;  %v1876_v5 = vadd.f32 %v1875_v15, %v3884_v57  ;;  %v2121_v50 = vmax.f32 %v1872_v59, 0.0  ;;  %v2120_v59 = vmax.f32 %v1870_v18, 0.0 }
 0x253   : > { %v1877_v38 = vpop.f32.mrf.mxu1  ;;  %v1805_v54 = vadd.f32 %v1804_v4, %v3884_v57  ;;  %v2134_v28 = vmax.f32 %v1803_v49, 0.0  ;;  %v2201_v49 = vpack.c.bf16 %v2119_v53, %v2103_v39 }
 0x254   : > { %v1806_v8 = vpop.f32.mrf.mxu0  ;;  %v1878_v48 = vadd.f32 %v1877_v38, %v3884_v57  ;;  %v2136_v42 = vmax.f32 %v1876_v5, 0.0  ;;  %v2105_v38 = vmax.f32 %v1868_v41, 0.0 }
 0x255   : > { %v1807_v3 = vadd.f32 %v1806_v8, %v3886_v32  ;;  %v1879_v2 = vpop.f32.mrf.mxu1  ;;  %v2135_v6 = vmax.f32 %v1805_v54, 0.0  ;;  %v2118_v8 = vmax.f32 %v1797_v37, 0.0  ;;  %v2104_v37 = vmax.f32 %v1866_v30, 0.0 }
 0x256   : > { %v1880_v17 = vadd.f32 %v1879_v2, %v3886_v32  ;;  %v1808_v9 = vpop.f32.mrf.mxu0  ;;  %v2137_v21 = vmax.f32 %v1878_v48, 0.0  ;;  %v2087_v2 = vmax.f32 %v4133_v12, 0.0  ;;  %v2203_v41 = vpack.c.bf16 %v2121_v50, %v2105_v38 }
 0x257   : > { %v1809_v23 = vadd.f32 %v1808_v9, %v3886_v32  ;;  %v1881_v20 = vpop.f32.mrf.mxu1  ;;  %v2150_v43 = vmax.f32 %v1807_v3, 0.0  ;;  %v2089_v9 = vmax.f32 %v4136_v19, 0.0  ;;  %v1777_v12 = vadd.f32 %v4064_v45, %v3902_v60 }
 0x258   : > { %v1882_v51 = vadd.f32 %v1881_v20, %v3886_v32  ;;  %v4155_v24 = vpop.f32.mrf.mxu0  ;;  %v2152_v36 = vmax.f32 %v1880_v17, 0.0  ;;  %v2071_v20 = vmax.f32 %v4121_v34, 0.0  ;;  %v2073_v19 = vmax.f32 %v4124_v33, 0.0 }
 0x259   : > { %v2151_v58 = vmax.f32 %v1809_v23, 0.0  ;;  %v4157_v55 = vpop.f32.mrf.mxu1  ;;  %v2216_v22 = vpack.c.bf16 %v2150_v43, %v2134_v28  ;;  %v1856_v23 = vadd.f32 %v4090_v63, %v3896_v35  ;;  %v2200_v43 = vpack.c.bf16 %v2118_v8, %v2102_v56 }
 0x25a   : > { %v2153_v47 = vmax.f32 %v1882_v51, 0.0  ;;  %v4159_v1 = vpop.f32.mrf.mxu0  ;;  %v2218_v48 = vpack.c.bf16 %v2152_v36, %v2136_v42  ;;  %v2055_v63 = vmax.f32 %v4114_v26, 0.0  ;;  %v2088_v34 = vmax.f32 %v4130_v10, 0.0 }
 0x25b   : > { %v2217_v15 = vpack.c.bf16 %v2151_v58, %v2135_v6  ;;  %v4162_v4 = vpop.f32.mrf.mxu1  ;;  %v2185_v51 = vpack.c.bf16 %v2087_v2, %v2071_v20  ;;  %v2202_v53 = vpack.c.bf16 %v2120_v59, %v2104_v37  ;;  %v1773_v36 = vadd.f32 %v4054_v27, %v3900_v62 }
 0x25c   : > { %v2219_v54 = vpack.c.bf16 %v2153_v47, %v2137_v21  ;;  %v4164_v3 = vpop.f32.mrf.mxu0  ;;  %v2070_v33 = vmax.f32 %v1783_v40, 0.0  ;;  %v2187_v58 = vpack.c.bf16 %v2089_v9, %v2073_v19  ;;  %v1846_v50 = vadd.f32 %v4056_v13, %v3900_v62 }
 0x25d   : > { %v4167_v17 = vpop.f32.mrf.mxu1  ;;  %2424 = vmatprep.subr.bf16.mxu0 %v2217_v15  ;;  %v2039_v26 = vmax.f32 %v4106_v44, 0.0  ;;  %v2072_v28 = vmax.f32 %v1856_v23, 0.0  ;;  %v2041_v21 = vmax.f32 %v4110_v46, 0.0  ;;  %v2054_v47 = vmax.f32 %v1777_v12, 0.0 }
 0x25e   : > { %2467 = vmatprep.subr.bf16.mxu1 %v2219_v54  ;;  %v4173_v5 = vpop.f32.mrf.mxu0  ;;  %2425 = vmatpush1.bf16.msra.mxu0 %v2216_v22  ;;  %v2184_v30 = vpack.c.bf16 %v2086_v7, %v2070_v33  ;;  %v2038_v38 = vmax.f32 %v1773_v36, 0.0  ;;  %v2040_v13 = vmax.f32 %v1846_v50, 0.0  ;;  %v4207_v20 = vadd.f32 %v4159_v1, %v3900_v62 }
 0x25f   : > { %v4180_v18 = vpop.f32.mrf.mxu1  ;;  %2468 = vmatpush1.bf16.msra.mxu1 %v2218_v48  ;;  %2426 = vmatprep.subr.bf16.mxu0 %v2201_v49  ;;  %v2169_v39 = vpack.c.bf16 %v2055_v63, %v2039_v26  ;;  %v2186_v42 = vpack.c.bf16 %v2088_v34, %v2072_v28  ;;  %v2171_v8 = vpack.c.bf16 %v2057_v11, %v2041_v21 }
 0x260   : > { %2469 = vmatprep.subr.bf16.mxu1 %v2203_v41  ;;  %v4186_v45 = vpop.f32.mrf.mxu0  ;;  %v2168_v54 = vpack.c.bf16 %v2054_v47, %v2038_v38  ;;  %v2170_v46 = vpack.c.bf16 %v2056_v29, %v2040_v13  ;;  %v4211_v37 = vadd.f32 %v4162_v4, %v3900_v62  ;;  %v4215_v19 = vadd.f32 %v4173_v5, %v3902_v60 }
 0x261   : > { %v4190_v6 = vpop.f32.mrf.mxu1  ;;  %v4219_v7 = vadd.f32 %v4180_v18, %v3902_v60 }
 0x262   : > { %v1930_v25 = vpop.f32.mrf.mxu0  ;;  %2427 = vmatpush1.bf16.msra.mxu0 %v2200_v43 }
 0x263   : > { %v2003_v10 = vpop.f32.mrf.mxu1  ;;  %2470 = vmatpush1.bf16.msra.mxu1 %v2202_v53  ;;  %2428 = vmatprep.subr.bf16.mxu0 %v2185_v51 }
 0x264   : > { %2471 = vmatprep.subr.bf16.mxu1 %v2187_v58  ;;  %v1932_v27 = vpop.f32.mrf.mxu0  ;;  %v4225_v43 = vadd.f32 %v2003_v10, %v3896_v35 }
 0x265   : > { %v2005_v15 = vpop.f32.mrf.mxu1  ;;  %v4228_v63 = vadd.f32 %v1932_v27, %v3898_v16 }
 0x266   : > { %v1934_v22 = vpop.f32.mrf.mxu0  ;;  %2429 = vmatpush1.bf16.msra.mxu0 %v2184_v30  ;;  %v4231_v4 = vadd.f32 %v2005_v15, %v3898_v16 }
 0x267   : > { %v2007_v44 = vpop.f32.mrf.mxu1  ;;  %2472 = vmatpush1.bf16.msra.mxu1 %v2186_v42  ;;  %2430 = vmatprep.subr.bf16.mxu0 %v2169_v39  ;;  %v4234_v5 = vadd.f32 %v1934_v22, %v3898_v16 }
 0x268   : > { %2473 = vmatprep.subr.bf16.mxu1 %v2171_v8  ;;  %v1938_v2 = vpop.f32.mrf.mxu0  ;;  %v4237_v34 = vadd.f32 %v2007_v44, %v3898_v16 }
 0x269   : > { %v2011_v59 = vpop.f32.mrf.mxu1  ;;  %v1939_v51 = vadd.f32 %v1938_v2, %v3892_v61 }
 0x26a   : > { %v1940_v49 = vpop.f32.mrf.mxu0  ;;  %2431 = vmatpush1.bf16.msra.mxu0 %v2168_v54 }
 0x26b   : > { %v2013_v48 = vpop.f32.mrf.mxu1  ;;  %2474 = vmatpush1.bf16.msra.mxu1 %v2170_v46  ;;  %v1941_v28 = vadd.f32 %v1940_v49, %v3892_v61 }
 0x26c   : > { %v1942_v40 = vpop.f32.mrf.mxu0  ;;  %v2014_v10 = vadd.f32 %v2013_v48, %v3892_v61 }
 0x26d   : > { %v2015_v9 = vpop.f32.mrf.mxu1  ;;  %2825 = vmatmul.mubr.msk.bf16.vlgmr.msra.gmra.mxu0 %vm1433_vm1, %v3998_v52  ;;  %v1943_v27 = vadd.f32 %v1942_v40, %v3894_v31  ;;  %v2107_v46 = vmax.f32 %v1941_v28, 0.0 }
 0x26e   : > { %2826 = vmatmul.mubr.msk.bf16.vlgmr.msra.gmra.mxu1 %vm1433_vm1, %v3998_v52  ;;  %v1944_v56 = vpop.f32.mrf.mxu0  ;;  %2534 = vmatprep.mubr.bf16.mxu0 %v2998_v0  ;;  %v2016_v29 = vadd.f32 %v2015_v9, %v3894_v31  ;;  %v2091_v9 = vmax.f32 %v4234_v5, 0.0 }
 0x26f   : > { %v2017_v41 = vpop.f32.mrf.mxu1  ;;  %2577 = vmatprep.mubr.bf16.mxu1 %v2998_v0  ;;  %v4222_v0 = vadd.f32 %v1930_v25, %v3896_v35  ;;  %v1945_v53 = vadd.f32 %v1944_v56, %v3894_v31  ;;  %v2109_v56 = vmax.f32 %v2014_v10, 0.0  ;;  %v2122_v40 = vmax.f32 %v1943_v27, 0.0 }
 0x270   : > { %v1948_v12 = vpop.f32.mrf.mxu0  ;;  %v2018_v58 = vadd.f32 %v2017_v41, %v3894_v31 }
 0x271   : > { %v2021_v23 = vpop.f32.mrf.mxu1  ;;  %v1949_v25 = vadd.f32 %v1948_v12, %v3884_v57  ;;  %v2123_v15 = vmax.f32 %v1945_v53, 0.0  ;;  %v2002_v53 = vadd.f32 %v4190_v6, %v3896_v35  ;;  %v2075_v5 = vmax.f32 %v4222_v0, 0.0 }
 0x272   : > { %v1950_v14 = vpop.f32.mrf.mxu0  ;;  %v2022_v21 = vadd.f32 %v2021_v23, %v3884_v57  ;;  %v2125_v13 = vmax.f32 %v2018_v58, 0.0  ;;  %v1919_v6 = vadd.f32 %v4155_v24, %v3900_v62  ;;  %v2061_v0 = vmax.f32 %v4219_v7, 0.0 }
 0x273   : > { %v2023_v1 = vpop.f32.mrf.mxu1  ;;  %v1951_v36 = vadd.f32 %v1950_v14, %v3884_v57  ;;  %v2138_v44 = vmax.f32 %v1949_v25, 0.0  ;;  %v2205_v12 = vpack.c.bf16 %v2123_v15, %v2107_v46  ;;  %v1929_v14 = vadd.f32 %v4186_v45, %v3896_v35 }
 0x274   : > { %v1952_v18 = vpop.f32.mrf.mxu0  ;;  %v2024_v50 = vadd.f32 %v2023_v1, %v3884_v57  ;;  %v2012_v57 = vadd.f32 %v2011_v59, %v3892_v61  ;;  %v2140_v49 = vmax.f32 %v2022_v21, 0.0  ;;  %v2093_v1 = vmax.f32 %v4237_v34, 0.0 }
 0x275   : > { %v1953_v11 = vadd.f32 %v1952_v18, %v3886_v32  ;;  %v2025_v33 = vpop.f32.mrf.mxu1  ;;  %v2139_v38 = vmax.f32 %v1951_v36, 0.0  ;;  %v2106_v18 = vmax.f32 %v1939_v51, 0.0  ;;  %v2207_v61 = vpack.c.bf16 %v2125_v13, %v2109_v56 }
 0x276   : > { %v2026_v26 = vadd.f32 %v2025_v33, %v3886_v32  ;;  %v1954_v16 = vpop.f32.mrf.mxu0  ;;  %v2141_v54 = vmax.f32 %v2024_v50, 0.0  ;;  %v1923_v59 = vadd.f32 %v4164_v3, %v3902_v60  ;;  %v2108_v36 = vmax.f32 %v2012_v57, 0.0 }
 0x277   : > { %v1955_v47 = vadd.f32 %v1954_v16, %v3886_v32  ;;  %v2027_v30 = vpop.f32.mrf.mxu1  ;;  %v2154_v39 = vmax.f32 %v1953_v11, 0.0  ;;  %v1996_v45 = vadd.f32 %v4167_v17, %v3902_v60  ;;  %v2077_v34 = vmax.f32 %v4225_v43, 0.0 }
 0x278   : > { %v2028_v42 = vadd.f32 %v2027_v30, %v3886_v32  ;;  %v2156_v8 = vmax.f32 %v2026_v26, 0.0  ;;  %v2124_v32 = vmax.f32 %v2016_v29, 0.0  ;;  %v2090_v51 = vmax.f32 %v4228_v63, 0.0 }
 0x279   : > { %v2155_v22 = vmax.f32 %v1955_v47, 0.0  ;;  %v2220_v41 = vpack.c.bf16 %v2154_v39, %v2138_v44  ;;  %v2204_v11 = vpack.c.bf16 %v2122_v40, %v2106_v18  ;;  %v2059_v33 = vmax.f32 %v4215_v19, 0.0  ;;  %v4291_v39 = vpop.permute.xlu1 %2233 }
 0x27a   : > { %v2157_v2 = vmax.f32 %v2028_v42, 0.0  ;;  %v2222_v23 = vpack.c.bf16 %v2156_v8, %v2140_v49  ;;  %v2092_v3 = vmax.f32 %v4231_v4, 0.0  ;;  %v2189_v58 = vpack.c.bf16 %v2091_v9, %v2075_v5 }
 0x27b   : > { %v2221_v48 = vpack.c.bf16 %v2155_v22, %v2139_v38  ;;  %v2206_v35 = vpack.c.bf16 %v2124_v32, %v2108_v36  ;;  %v2074_v25 = vmax.f32 %v1929_v14, 0.0  ;;  %v2191_v50 = vpack.c.bf16 %v2093_v1, %v2077_v34 }
 0x27c   : > { %v2223_v31 = vpack.c.bf16 %v2157_v2, %v2141_v54  ;;  %v1992_v60 = vadd.f32 %v4157_v55, %v3900_v62  ;;  %v2043_v17 = vmax.f32 %v4207_v20, 0.0  ;;  %v2076_v43 = vmax.f32 %v2002_v53, 0.0  ;;  %v4281_v20 = vpop.permute.xlu0 %2228 }
 0x27d   : > { %2510 = vmatprep.subr.bf16.mxu0 %v2221_v48  ;;  %v2045_v19 = vmax.f32 %v4211_v37, 0.0  ;;  %v2058_v63 = vmax.f32 %v1923_v59, 0.0  ;;  %v2188_v4 = vpack.c.bf16 %v2090_v51, %v2074_v25  ;;  %v2060_v26 = vmax.f32 %v1996_v45, 0.0 }
 0x27e   : > { %2553 = vmatprep.subr.bf16.mxu1 %v2223_v31  ;;  %2511 = vmatpush1.bf16.msra.mxu0 %v2220_v41  ;;  %v2173_v24 = vpack.c.bf16 %v2059_v33, %v2043_v17  ;;  %v2190_v16 = vpack.c.bf16 %v2092_v3, %v2076_v43  ;;  %v2042_v7 = vmax.f32 %v1919_v6, 0.0  ;;  %v2044_v10 = vmax.f32 %v1992_v60, 0.0 }
 0x27f   : > { %2554 = vmatpush1.bf16.msra.mxu1 %v2222_v23  ;;  %2512 = vmatprep.subr.bf16.mxu0 %v2205_v12  ;;  %v2175_v28 = vpack.c.bf16 %v2061_v0, %v2045_v19 }
 0x280   : > { %2555 = vmatprep.subr.bf16.mxu1 %v2207_v61  ;;  %v2172_v62 = vpack.c.bf16 %v2058_v63, %v2042_v7  ;;  %v2174_v55 = vpack.c.bf16 %v2060_v26, %v2044_v10 }
 0x282   : > { %2513 = vmatpush1.bf16.msra.mxu0 %v2204_v11 }
 0x283   : > { %2556 = vmatpush1.bf16.msra.mxu1 %v2206_v35  ;;  %2514 = vmatprep.subr.bf16.mxu0 %v2189_v58 }
 0x284   : > { %2557 = vmatprep.subr.bf16.mxu1 %v2191_v50 }
 0x286   : > { %2515 = vmatpush1.bf16.msra.mxu0 %v2188_v4 }
 0x287   : > { %2558 = vmatpush1.bf16.msra.mxu1 %v2190_v16  ;;  %2516 = vmatprep.subr.bf16.mxu0 %v2173_v24 }
 0x288   : > { %2559 = vmatprep.subr.bf16.mxu1 %v2175_v28 }
 0x28a   : > { %2517 = vmatpush1.bf16.msra.mxu0 %v2172_v62 }
 0x28b   : > { %2560 = vmatpush1.bf16.msra.mxu1 %v2174_v55 }
 0x28d   : > { %2827 = vmatmul.mubr.msk.bf16.vlgmr.msra.gmra.mxu0 %vm1433_vm1, %v3998_v52 }
 0x28e   : > { %2828 = vmatmul.mubr.msk.bf16.vlgmr.msra.gmra.mxu1 %vm1433_vm1, %v3998_v52 }
 0x2ec   : > { %v2278_v37 = vpop.f32.mrf.mxu0 }
 0x2ed   : > { %v2279_v21 = vadd.f32 %v2278_v37, %v4281_v20  ;;  %v2321_v47 = vpop.f32.mrf.mxu1 }
 0x2ee   : > { %v2322_v30 = vadd.f32 %v2321_v47, %v4281_v20  ;;  %v2280_v27 = vpop.f32.mrf.mxu0 }
 0x2ef   : > { %2588 = vst [vmem:[%s4287_s11] sm:$0xff] %v2279_v21  ;;  %v2281_v52 = vadd.f32 %v2280_v27, %v4281_v20  ;;  %v2323_v29 = vpop.f32.mrf.mxu1 }
 0x2f0   : > { %2590 = vst [vmem:[%s4287_s11 + $0x10] sm:$0xff] %v2322_v30  ;;  %v2324_v42 = vadd.f32 %v2323_v29, %v4281_v20  ;;  %v2282_v15 = vpop.f32.mrf.mxu0 }
 0x2f1   : > { %2589 = vst [vmem:[%s4287_s11 + $0x8] sm:$0xff] %v2281_v52  ;;  %v2283_v38 = vadd.f32 %v2282_v15, %v4291_v39  ;;  %v2325_v8 = vpop.f32.mrf.mxu1 }
 0x2f2   : > { %2591 = vst [vmem:[%s4287_s11 + $0x18] sm:$0xff] %v2324_v42  ;;  %v2326_v22 = vadd.f32 %v2325_v8, %v4291_v39  ;;  %v2284_v13 = vpop.f32.mrf.mxu0 }
 0x2f3   : > { %2604 = vst [vmem:[%s4287_s11 + $0x80] sm:$0x1] %v2283_v38  ;;  %v2285_v44 = vadd.f32 %v2284_v13, %v4291_v39  ;;  %v2327_v54 = vpop.f32.mrf.mxu1 }
 0x2f4   : > { %2606 = vst [vmem:[%s4287_s11 + $0x90] sm:$0x1] %v2326_v22  ;;  %v2328_v2 = vadd.f32 %v2327_v54, %v4291_v39 }
 0x2f5   : > { %2605 = vst [vmem:[%s4287_s11 + $0x88] sm:$0x1] %v2285_v44 }
 0x2f6   : > { %2607 = vst [vmem:[%s4287_s11 + $0x98] sm:$0x1] %v2328_v2 }
 0x30d   : > { %v2364_v57 = vpop.f32.mrf.mxu0  ;;  %v2407_v46 = vpop.f32.mrf.mxu1 }
 0x30e   : > { %v2365_v49 = vadd.f32 %v2364_v57, %v4281_v20  ;;  %v2408_v48 = vadd.f32 %v2407_v46, %v4281_v20 }
 0x30f   : > { %v2366_v56 = vpop.f32.mrf.mxu0  ;;  %v2409_v40 = vpop.f32.mrf.mxu1 }
 0x310   : > { %2592 = vst [vmem:[%s4287_s11 + $0x20] sm:$0xff] %v2365_v49  ;;  %2594 = vst [vmem:[%s4287_s11 + $0x30] sm:$0xff] %v2408_v48  ;;  %v2367_v41 = vadd.f32 %v2366_v56, %v4281_v20  ;;  %v2410_v31 = vadd.f32 %v2409_v40, %v4281_v20 }
 0x311   : > { %v2368_v9 = vpop.f32.mrf.mxu0  ;;  %v2411_v32 = vpop.f32.mrf.mxu1 }
 0x312   : > { %2593 = vst [vmem:[%s4287_s11 + $0x28] sm:$0xff] %v2367_v41  ;;  %2595 = vst [vmem:[%s4287_s11 + $0x38] sm:$0xff] %v2410_v31  ;;  %v2369_v12 = vadd.f32 %v2368_v9, %v4291_v39  ;;  %v2412_v23 = vadd.f32 %v2411_v32, %v4291_v39 }
 0x313   : > { %v2370_v14 = vpop.f32.mrf.mxu0  ;;  %v2413_v1 = vpop.f32.mrf.mxu1 }
 0x314   : > { %2608 = vst [vmem:[%s4287_s11 + $0xa0] sm:$0x1] %v2369_v12  ;;  %2610 = vst [vmem:[%s4287_s11 + $0xb0] sm:$0x1] %v2412_v23  ;;  %v2371_v18 = vadd.f32 %v2370_v14, %v4291_v39  ;;  %v2414_v61 = vadd.f32 %v2413_v1, %v4291_v39 }
 0x316   : > { %2609 = vst [vmem:[%s4287_s11 + $0xa8] sm:$0x1] %v2371_v18  ;;  %2611 = vst [vmem:[%s4287_s11 + $0xb8] sm:$0x1] %v2414_v61 }
 0x32d   : > { %v2450_v59 = vpop.f32.mrf.mxu0 }
 0x32e   : > { %v2451_v53 = vadd.f32 %v2450_v59, %v4281_v20  ;;  %v2493_v5 = vpop.f32.mrf.mxu1 }
 0x32f   : > { %v2494_v36 = vadd.f32 %v2493_v5, %v4281_v20  ;;  %v2452_v45 = vpop.f32.mrf.mxu0 }
 0x330   : > { %2596 = vst [vmem:[%s4287_s11 + $0x40] sm:$0xff] %v2451_v53  ;;  %v2453_v34 = vadd.f32 %v2452_v45, %v4281_v20  ;;  %v2495_v51 = vpop.f32.mrf.mxu1 }
 0x331   : > { %2598 = vst [vmem:[%s4287_s11 + $0x50] sm:$0xff] %v2494_v36  ;;  %v2496_v11 = vadd.f32 %v2495_v51, %v4281_v20  ;;  %v2454_v33 = vpop.f32.mrf.mxu0 }
 0x332   : > { %2597 = vst [vmem:[%s4287_s11 + $0x48] sm:$0xff] %v2453_v34  ;;  %v2455_v3 = vadd.f32 %v2454_v33, %v4291_v39  ;;  %v2497_v58 = vpop.f32.mrf.mxu1 }
 0x333   : > { %2599 = vst [vmem:[%s4287_s11 + $0x58] sm:$0xff] %v2496_v11  ;;  %v2498_v35 = vadd.f32 %v2497_v58, %v4291_v39  ;;  %v2456_v6 = vpop.f32.mrf.mxu0 }
 0x334   : > { %2612 = vst [vmem:[%s4287_s11 + $0xc0] sm:$0x1] %v2455_v3  ;;  %v2457_v0 = vadd.f32 %v2456_v6, %v4291_v39  ;;  %v2499_v25 = vpop.f32.mrf.mxu1 }
 0x335   : > { %2614 = vst [vmem:[%s4287_s11 + $0xd0] sm:$0x1] %v2498_v35  ;;  %v2500_v50 = vadd.f32 %v2499_v25, %v4291_v39 }
 0x336   : > { %2613 = vst [vmem:[%s4287_s11 + $0xc8] sm:$0x1] %v2457_v0 }
 0x337   : > { %2615 = vst [vmem:[%s4287_s11 + $0xd8] sm:$0x1] %v2500_v50 }
 0x34d   : > { %v2536_v60 = vpop.f32.mrf.mxu0 }
 0x34e   : > { %v2537_v17 = vadd.f32 %v2536_v60, %v4281_v20  ;;  %v2579_v43 = vpop.f32.mrf.mxu1 }
 0x34f   : > { %v2580_v19 = vadd.f32 %v2579_v43, %v4281_v20  ;;  %v2538_v63 = vpop.f32.mrf.mxu0 }
 0x350   : > { %2600 = vst [vmem:[%s4287_s11 + $0x60] sm:$0xff] %v2537_v17  ;;  %v2539_v4 = vadd.f32 %v2538_v63, %v4281_v20  ;;  %v2581_v26 = vpop.f32.mrf.mxu1 }
 0x351   : > { %2602 = vst [vmem:[%s4287_s11 + $0x70] sm:$0xff] %v2580_v19  ;;  %v2582_v24 = vadd.f32 %v2581_v26, %v4281_v20  ;;  %v2540_v16 = vpop.f32.mrf.mxu0 }
 0x352   : > { %2601 = vst [vmem:[%s4287_s11 + $0x68] sm:$0xff] %v2539_v4  ;;  %v2541_v7 = vadd.f32 %v2540_v16, %v4291_v39  ;;  %v2583_v28 = vpop.f32.mrf.mxu1 }
 0x353   : > { %2603 = vst [vmem:[%s4287_s11 + $0x78] sm:$0xff] %v2582_v24  ;;  %v2584_v10 = vadd.f32 %v2583_v28, %v4291_v39  ;;  %v2542_v62 = vpop.f32.mrf.mxu0 }
 0x354   : > { %2616 = vst [vmem:[%s4287_s11 + $0xe0] sm:$0x1] %v2541_v7  ;;  %v2543_v55 = vadd.f32 %v2542_v62, %v4291_v39  ;;  %v2585_v20 = vpop.f32.mrf.mxu1 }
 0x355   : > { %2618 = vst [vmem:[%s4287_s11 + $0xf0] sm:$0x1] %v2584_v10  ;;  %v2586_v37 = vadd.f32 %v2585_v20, %v4291_v39 }
 0x356   : > { %2617 = vst [vmem:[%s4287_s11 + $0xe8] sm:$0x1] %v2543_v55 }
 0x357   : > { %2619 = vst [vmem:[%s4287_s11 + $0xf8] sm:$0x1] %v2586_v37 }
 0x358   : > { %2941 = shalt.err (!%p2938_p10)
}
 0x359   : > { %s2942_s9 = scalar_lea.hbm %s4352_s12, 4096  ;;  %s2946_s11 = scalar_lea.hbm %s4410_s7, 8192 }
 0x35a   : > { %p2943_p1 = scmp.ne.s32.totalorder %s4352_s12, %s2942_s9  ;;  %p2947_p0 = scmp.lt.s32.totalorder %s4352_s12, %s4410_s7 }
 0x35b   : > { %p2948_p2 = scmp.lt.s32.totalorder %s2946_s11, %s2942_s9 }
 0x35c   : > { %p2944_p3 = pnand %p2943_p1, %p4420_p12 }
 0x35d   : > { %p2949_p6 = por %p2948_p2, %p2947_p0 }
 0x35e   : > { %p2945_p9 = pneg %p2944_p3 }
 0x360   : > { %p2950_p11 = pnand %p2949_p6, %p2945_p9 }
 0x362   : > { %2953 = shalt.err (!%p2950_p11)
}
 0x363   : > { %s3000_s28 = smov 2048   ;;  %s3001_s22 = smov 4096  }
 0x364   : > { %s3002_s23 = smov 128  }
 0x365   : > { %2838 = dma.vmem_to_hbm [thread:$0]  (%p4420_p12), %s4356_s15, 4096, %s4352_s12, %s2621_s20, %s3000_s28, %s3001_s22, %s3002_s23  }
 0x366 PF: > { %s2649_s29 = sand.u32 1, %s2980_s24   ;;  %p4421_p13 = scmp.ne.s32.totalorder %s4416_s14, 0 }
 0x367   : > { %p4422_p4 = scmp.ge.s32.totalorder %s2992_s27, 2  ;;  %s2650_s21 = scalar_lea.sflag [#allocation4], %s2649_s29 }
 0x369   : > { %p2845_p5 = pnand %p4422_p4, %p4421_p13 }
 0x36b   : > { %p2846_p7 = pneg %p2845_p5 }
 0x36d   : > { %2975 = dma.done.wait (%p2846_p7), %s2650_s21, 4096  }
 0x36e   : > { %2977 = vsyncadd (%p2846_p7), %s2650_s21, 4294963200  ;;  %p20_p8 = scmp.ge.s32.totalorder %s3068_s30, 4   ;;  %s4423_s24 = smov %s2984_s25 }
 0x36f   : > { %s4424_s25 = smov %s2988_s26  ;;  %s4425_s26 = smov %s3080_s10 }
 0x370   : > { %s4426_s27 = smov %s3068_s30  ;;  %22 = sbr.rel (!%p20_p8) target bundleno = 5 (0x5), region = 93 }
 0x375   :  { %2655 = vsyncpa [#allocation3], 1 }
 0x376   :  { %2657 = vsyncpa [#allocation3 + $0x1], 1 }
 0x377   :  { %2658 = vsyncpa [#allocation4], 1 }
 0x378   :  { %2660 = vsyncpa [#allocation4 + $0x1], 1 }

</bundles_post_ra>
